<compile_context>
chip_gen: v7x
topology: tpu7x:2x2x1
jax: 0.10.0
libtpu: 0.0.40
codegen_flags: <defaults>
</compile_context>

<pallas_src>
import functools

import jax
import jax.numpy as jnp
from jax import lax
from jax.experimental import pallas as pl
from jax.experimental.pallas import tpu as pltpu


def resblock_kernel(xt_ref, xid_ref, w1_ref, b1_ref, w2t_ref, b2_ref, o_ref,
                    *, H, TH, W, C):
    # xt_ref  : (1, TH+4, W+2, C)  x tile: 2-row halo each side, 1-col zero pad
    # xid_ref : (1, C, TH*W)       identity tile, channel-major, lane-dense
    # w1_ref  : (9*C, C)           conv1 weights, im2col layout (dy, dx, cin) x cout
    # b1_ref  : (1, C)
    # w2t_ref : (C, 9*C)           conv2 weights, transposed im2col layout
    # b2_ref  : (C, 1)
    # o_ref   : (1, C, TH*W)
    t = pl.program_id(1)

    xt = xt_ref[0]                                        # (TH+4, W+2, C)

    # ---- conv1 + bias + ReLU: one K = 9C matmul over a (TH+2)-row window ----
    p1 = jnp.concatenate(
        [xt[dy:dy + TH + 2, dx:dx + W, :] for dy in range(3) for dx in range(3)],
        axis=-1)                                          # (TH+2, W, 9C)
    h1 = jnp.dot(p1.reshape((TH + 2) * W, 9 * C), w1_ref[...],
                 preferred_element_type=jnp.float32)      # ((TH+2)*W, C)
    h1 = jnp.maximum(h1 + b1_ref[...], 0.0)

    # Halo rows that fall outside the image must be zero (conv2 zero padding);
    # interior-tile halo rows keep their computed values.  Mask is a cheap
    # (TH+2, 1, 1) row-index broadcast, not a full 3-D iota.
    mid = h1.reshape(TH + 2, W, C)
    row_img = t * TH + lax.broadcasted_iota(jnp.int32, (TH + 2, 1, 1), 0) - 1
    mid = jnp.where((row_img >= 0) & (row_img < H), mid, 0.0)

    # Zero-pad the W border in registers (no VMEM scratch round trip).
    zcol = jnp.zeros((TH + 2, 1, C), jnp.float32)
    midp = jnp.concatenate([zcol, mid, zcol], axis=1)     # (TH+2, W+2, C)

    # ---- conv2: one K = 9C matmul, transposed so the result is lane-dense ---
    p2 = jnp.concatenate(
        [midp[dy:dy + TH, dx:dx + W, :] for dy in range(3) for dx in range(3)],
        axis=-1).reshape(TH * W, 9 * C)                   # (TH*W, 9C)
    h2t = lax.dot_general(w2t_ref[...], p2, (((1,), (1,)), ((), ())),
                          preferred_element_type=jnp.float32)   # (C, TH*W)

    # ---- bias2 + residual + store: all full-lane (TH*W = 128 on lanes) ------
    res = xid_ref[0] + h2t + b2_ref[...]
    o_ref[...] = res.astype(o_ref.dtype).reshape(1, C, TH * W)


def residual_block_nobn(x_nchw, w1, b1, w2, b2, *, tile_h=8):
    """x_nchw: (B, C, H, W); w*: torch conv layout (Cout, Cin, 3, 3); b*: (C,)."""
    B, C, H, W = x_nchw.shape
    TH = tile_h if (H % tile_h == 0) else H
    nT = H // TH

    # ---- wrapper glue: layout plumbing only ---------------------------------
    x_nhwc = jnp.transpose(x_nchw, (0, 2, 3, 1))                    # (B,H,W,C)
    # Overlapping row tiles: 2-row halo each side (fused conv-conv needs it),
    # plus the usual 1-column zero pad for the 3x3 convs.
    xpad = jnp.pad(x_nhwc, ((0, 0), (2, 2), (1, 1), (0, 0)))        # (B,H+4,W+2,C)
    x_tiles = jnp.stack(
        [xpad[:, t * TH:t * TH + TH + 4] for t in range(nT)], axis=1)
    x_tiles = x_tiles.reshape(B * nT, TH + 4, W + 2, C)
    # Identity in channel-major tile layout: last dim TH*W (lane-dense).
    x_idT = (x_nchw.reshape(B, C, nT, TH, W)
             .transpose(0, 2, 1, 3, 4)
             .reshape(B * nT, C, TH * W))
    # im2col weight layouts.
    w1f = jnp.transpose(w1, (2, 3, 1, 0)).reshape(9 * C, C)         # (9C, C)
    w2t = jnp.transpose(w2, (2, 3, 1, 0)).reshape(9 * C, C).T       # (C, 9C)
    b1r = b1.reshape(1, C)
    b2r = b2.reshape(C, 1)

    kernel = functools.partial(resblock_kernel, H=H, TH=TH, W=W, C=C)

    out_t = pl.pallas_call(
        kernel,
        out_shape=jax.ShapeDtypeStruct((B * nT, C, TH * W), x_nchw.dtype),
        grid_spec=pltpu.PrefetchScalarGridSpec(
            num_scalar_prefetch=0,
            grid=(B, nT),
            in_specs=[
                pl.BlockSpec((1, TH + 4, W + 2, C),
                             lambda b, t: (b * nT + t, 0, 0, 0)),
                pl.BlockSpec((1, C, TH * W),
                             lambda b, t: (b * nT + t, 0, 0)),
                pl.BlockSpec((9 * C, C), lambda b, t: (0, 0)),
                pl.BlockSpec((1, C), lambda b, t: (0, 0)),
                pl.BlockSpec((C, 9 * C), lambda b, t: (0, 0)),
                pl.BlockSpec((C, 1), lambda b, t: (0, 0)),
            ],
            out_specs=pl.BlockSpec((1, C, TH * W),
                                   lambda b, t: (b * nT + t, 0, 0)),
        ),
        compiler_params=pltpu.CompilerParams(
            dimension_semantics=("parallel", "parallel")),
    )(x_tiles, x_idT, w1f, b1r, w2t, b2r)

    # Back to NCHW.
    return (out_t.reshape(B, nT, C, TH, W)
            .transpose(0, 2, 1, 3, 4)
            .reshape(B, C, H, W))


def ref_forward(x_nchw, w1, b1, w2, b2):
    """Pure-JAX reference matching the PyTorch forward."""
    dn = ("NCHW", "OIHW", "NCHW")
    c1 = jax.lax.conv_general_dilated(x_nchw, w1, (1, 1), ((1, 1), (1, 1)),
                                      dimension_numbers=dn)
    c1 = jnp.maximum(c1 + b1[None, :, None, None], 0.0)
    c2 = jax.lax.conv_general_dilated(c1, w2, (1, 1), ((1, 1), (1, 1)),
                                      dimension_numbers=dn)
    c2 = c2 + b2[None, :, None, None]
    return x_nchw + c2


if __name__ == "__main__":
    B, C, H, W = 2, 16, 16, 16   # nf = 16 (small synthetic size)

    key = jax.random.PRNGKey(0)
    kx, kw1, kw2, kb1, kb2 = jax.random.split(key, 5)

    # "initialize_weights": kaiming_normal fan_in (gain=sqrt(2)) scaled by 0.1.
    # Biases are zero at init; use small nonzero biases here to exercise the
    # bias path of the kernel.
    fan_in = C * 3 * 3
    std = (2.0 / fan_in) ** 0.5
    w1 = jax.random.normal(kw1, (C, C, 3, 3), jnp.float32) * std * 0.1
    w2 = jax.random.normal(kw2, (C, C, 3, 3), jnp.float32) * std * 0.1
    b1 = jax.random.normal(kb1, (C,), jnp.float32) * 0.01
    b2 = jax.random.normal(kb2, (C,), jnp.float32) * 0.01

    x = jax.random.normal(kx, (B, C, H, W), jnp.float32)

    fwd = jax.jit(residual_block_nobn)
    out = fwd(x, w1, b1, w2, b2)
    out = jax.block_until_ready(out)

    ref = ref_forward(x, w1, b1, w2, b2)
    assert out.shape == (B, C, H, W)
    err = float(jnp.max(jnp.abs(out - ref)))
    assert err < 1e-4, f"max abs err {err}"

    print("KERNEL_OK")
</pallas_src>

<mosaic_0001>
module attributes {stable_mosaic.version = 11 : i64} {
  func.func @resblock_kernel(%arg0: i32, %arg1: i32, %arg2: memref<1x12x18x16xf32, #tpu.memory_space<vmem>>, %arg3: memref<1x16x128xf32, #tpu.memory_space<vmem>>, %arg4: memref<144x16xf32, #tpu.memory_space<vmem>>, %arg5: memref<1x16xf32, #tpu.memory_space<vmem>>, %arg6: memref<16x144xf32, #tpu.memory_space<vmem>>, %arg7: memref<16x1xf32, #tpu.memory_space<vmem>>, %arg8: memref<1x16x128xf32, #tpu.memory_space<vmem>>) attributes {dimension_semantics = [#tpu.dimension_semantics<parallel>, #tpu.dimension_semantics<parallel>], iteration_bounds = array<i64: 2, 2>, scalar_prefetch = 0 : i64, scratch_operands = 0 : i64, tpu.core_type = #tpu.core_type<tc>, window_params = [{transform_indices = @transform_0, window_bounds = array<i64: 1, 12, 18, 16>}, {transform_indices = @transform_1, window_bounds = array<i64: 1, 16, 128>}, {pipeline_mode = #tpu.pipeline_mode<synchronous>, transform_indices = @transform_2, window_bounds = array<i64: 144, 16>}, {pipeline_mode = #tpu.pipeline_mode<synchronous>, transform_indices = @transform_3, window_bounds = array<i64: 1, 16>}, {pipeline_mode = #tpu.pipeline_mode<synchronous>, transform_indices = @transform_4, window_bounds = array<i64: 16, 144>}, {pipeline_mode = #tpu.pipeline_mode<synchronous>, transform_indices = @transform_5, window_bounds = array<i64: 16, 1>}, {transform_indices = @transform_6, window_bounds = array<i64: 1, 16, 128>}]} {
    %c0 = arith.constant 0 : index
    %c0_0 = arith.constant 0 : index
    %c0_1 = arith.constant 0 : index
    %c0_2 = arith.constant 0 : index
    %0 = vector.load %arg2[%c0, %c0_0, %c0_1, %c0_2] : memref<1x12x18x16xf32, #tpu.memory_space<vmem>>, vector<1x12x18x16xf32>
    %1 = vector.shape_cast %0 : vector<1x12x18x16xf32> to vector<12x18x16xf32>
    %2 = vector.extract_strided_slice %1 {offsets = [0, 0, 0], sizes = [10, 16, 16], strides = [1, 1, 1]} : vector<12x18x16xf32> to vector<10x16x16xf32>
    %3 = vector.extract_strided_slice %1 {offsets = [0, 1, 0], sizes = [10, 16, 16], strides = [1, 1, 1]} : vector<12x18x16xf32> to vector<10x16x16xf32>
    %4 = vector.extract_strided_slice %1 {offsets = [0, 2, 0], sizes = [10, 16, 16], strides = [1, 1, 1]} : vector<12x18x16xf32> to vector<10x16x16xf32>
    %5 = vector.extract_strided_slice %1 {offsets = [1, 0, 0], sizes = [10, 16, 16], strides = [1, 1, 1]} : vector<12x18x16xf32> to vector<10x16x16xf32>
    %6 = vector.extract_strided_slice %1 {offsets = [1, 1, 0], sizes = [10, 16, 16], strides = [1, 1, 1]} : vector<12x18x16xf32> to vector<10x16x16xf32>
    %7 = vector.extract_strided_slice %1 {offsets = [1, 2, 0], sizes = [10, 16, 16], strides = [1, 1, 1]} : vector<12x18x16xf32> to vector<10x16x16xf32>
    %8 = vector.extract_strided_slice %1 {offsets = [2, 0, 0], sizes = [10, 16, 16], strides = [1, 1, 1]} : vector<12x18x16xf32> to vector<10x16x16xf32>
    %9 = vector.extract_strided_slice %1 {offsets = [2, 1, 0], sizes = [10, 16, 16], strides = [1, 1, 1]} : vector<12x18x16xf32> to vector<10x16x16xf32>
    %10 = vector.extract_strided_slice %1 {offsets = [2, 2, 0], sizes = [10, 16, 16], strides = [1, 1, 1]} : vector<12x18x16xf32> to vector<10x16x16xf32>
    %11 = tpu.concatenate %2, %3, %4, %5, %6, %7, %8, %9, %10 in 2 : vector<10x16x16xf32>, vector<10x16x16xf32>, vector<10x16x16xf32>, vector<10x16x16xf32>, vector<10x16x16xf32>, vector<10x16x16xf32>, vector<10x16x16xf32>, vector<10x16x16xf32>, vector<10x16x16xf32> -> vector<10x16x144xf32>
    %12 = vector.shape_cast %11 : vector<10x16x144xf32> to vector<160x144xf32>
    %c0_3 = arith.constant 0 : index
    %c0_4 = arith.constant 0 : index
    %13 = vector.load %arg4[%c0_3, %c0_4] : memref<144x16xf32, #tpu.memory_space<vmem>>, vector<144x16xf32>
    %cst = arith.constant dense<0.000000e+00> : vector<160x16xf32>
    %14 = tpu.matmul %12, %13, %cst {dimension_numbers = #tpu.dot_dimension_numbers<[1], [0], [0], [1], [0, 0, 1, 1], [], []>} : vector<160x144xf32>, vector<144x16xf32>, vector<160x16xf32> -> vector<160x16xf32>
    %c0_5 = arith.constant 0 : index
    %c0_6 = arith.constant 0 : index
    %15 = vector.load %arg5[%c0_5, %c0_6] : memref<1x16xf32, #tpu.memory_space<vmem>>, vector<1x16xf32>
    %16 = vector.broadcast %15 : vector<1x16xf32> to vector<160x16xf32>
    %17 = arith.addf %14, %16 : vector<160x16xf32>
    %cst_7 = arith.constant 0.000000e+00 : f32
    %18 = vector.broadcast %cst_7 : f32 to vector<160x16xf32>
    %19 = arith.maximumf %17, %18 : vector<160x16xf32>
    %20 = vector.shape_cast %19 : vector<160x16xf32> to vector<10x16x16xf32>
    %c8_i32 = arith.constant 8 : i32
    %21 = arith.muli %arg1, %c8_i32 : i32
    %22 = tpu.iota {dimensions = array<i32: 0>} : vector<10x1x1xi32>
    %23 = vector.broadcast %21 : i32 to vector<10x1x1xi32>
    %24 = arith.addi %23, %22 : vector<10x1x1xi32>
    %c1_i32 = arith.constant 1 : i32
    %25 = vector.broadcast %c1_i32 : i32 to vector<10x1x1xi32>
    %26 = arith.subi %24, %25 : vector<10x1x1xi32>
    %c0_i32 = arith.constant 0 : i32
    %27 = vector.broadcast %c0_i32 : i32 to vector<10x1x1xi32>
    %28 = arith.cmpi sge, %26, %27 : vector<10x1x1xi32>
    %c16_i32 = arith.constant 16 : i32
    %29 = vector.broadcast %c16_i32 : i32 to vector<10x1x1xi32>
    %30 = arith.cmpi slt, %26, %29 : vector<10x1x1xi32>
    %31 = arith.andi %28, %30 : vector<10x1x1xi1>
    %cst_8 = arith.constant 0.000000e+00 : f32
    %32 = vector.shape_cast %31 : vector<10x1x1xi1> to vector<10x1x1xi1>
    %33 = vector.broadcast %32 : vector<10x1x1xi1> to vector<10x16x16xi1>
    %34 = vector.broadcast %cst_8 : f32 to vector<10x16x16xf32>
    %35 = arith.select %33, %20, %34 : vector<10x16x16xi1>, vector<10x16x16xf32>
    %cst_9 = arith.constant 0.000000e+00 : f32
    %36 = vector.broadcast %cst_9 : f32 to vector<10x1x16xf32>
    %37 = tpu.concatenate %36, %35, %36 in 1 : vector<10x1x16xf32>, vector<10x16x16xf32>, vector<10x1x16xf32> -> vector<10x18x16xf32>
    %38 = vector.extract_strided_slice %37 {offsets = [0, 0, 0], sizes = [8, 16, 16], strides = [1, 1, 1]} : vector<10x18x16xf32> to vector<8x16x16xf32>
    %39 = vector.extract_strided_slice %37 {offsets = [0, 1, 0], sizes = [8, 16, 16], strides = [1, 1, 1]} : vector<10x18x16xf32> to vector<8x16x16xf32>
    %40 = vector.extract_strided_slice %37 {offsets = [0, 2, 0], sizes = [8, 16, 16], strides = [1, 1, 1]} : vector<10x18x16xf32> to vector<8x16x16xf32>
    %41 = vector.extract_strided_slice %37 {offsets = [1, 0, 0], sizes = [8, 16, 16], strides = [1, 1, 1]} : vector<10x18x16xf32> to vector<8x16x16xf32>
    %42 = vector.extract_strided_slice %37 {offsets = [1, 1, 0], sizes = [8, 16, 16], strides = [1, 1, 1]} : vector<10x18x16xf32> to vector<8x16x16xf32>
    %43 = vector.extract_strided_slice %37 {offsets = [1, 2, 0], sizes = [8, 16, 16], strides = [1, 1, 1]} : vector<10x18x16xf32> to vector<8x16x16xf32>
    %44 = vector.extract_strided_slice %37 {offsets = [2, 0, 0], sizes = [8, 16, 16], strides = [1, 1, 1]} : vector<10x18x16xf32> to vector<8x16x16xf32>
    %45 = vector.extract_strided_slice %37 {offsets = [2, 1, 0], sizes = [8, 16, 16], strides = [1, 1, 1]} : vector<10x18x16xf32> to vector<8x16x16xf32>
    %46 = vector.extract_strided_slice %37 {offsets = [2, 2, 0], sizes = [8, 16, 16], strides = [1, 1, 1]} : vector<10x18x16xf32> to vector<8x16x16xf32>
    %47 = tpu.concatenate %38, %39, %40, %41, %42, %43, %44, %45, %46 in 2 : vector<8x16x16xf32>, vector<8x16x16xf32>, vector<8x16x16xf32>, vector<8x16x16xf32>, vector<8x16x16xf32>, vector<8x16x16xf32>, vector<8x16x16xf32>, vector<8x16x16xf32>, vector<8x16x16xf32> -> vector<8x16x144xf32>
    %48 = vector.shape_cast %47 : vector<8x16x144xf32> to vector<128x144xf32>
    %c0_10 = arith.constant 0 : index
    %c0_11 = arith.constant 0 : index
    %49 = vector.load %arg6[%c0_10, %c0_11] : memref<16x144xf32, #tpu.memory_space<vmem>>, vector<16x144xf32>
    %cst_12 = arith.constant dense<0.000000e+00> : vector<16x128xf32>
    %50 = tpu.matmul %49, %48, %cst_12 {dimension_numbers = #tpu.dot_dimension_numbers<[1], [1], [0], [0], [0, 0, 1, 0], [], []>} : vector<16x144xf32>, vector<128x144xf32>, vector<16x128xf32> -> vector<16x128xf32>
    %c0_13 = arith.constant 0 : index
    %c0_14 = arith.constant 0 : index
    %c0_15 = arith.constant 0 : index
    %51 = vector.load %arg3[%c0_13, %c0_14, %c0_15] : memref<1x16x128xf32, #tpu.memory_space<vmem>>, vector<1x16x128xf32>
    %52 = vector.shape_cast %51 : vector<1x16x128xf32> to vector<16x128xf32>
    %53 = arith.addf %52, %50 : vector<16x128xf32>
    %c0_16 = arith.constant 0 : index
    %c0_17 = arith.constant 0 : index
    %54 = vector.load %arg7[%c0_16, %c0_17] : memref<16x1xf32, #tpu.memory_space<vmem>>, vector<16x1xf32>
    %55 = vector.broadcast %54 : vector<16x1xf32> to vector<16x128xf32>
    %56 = arith.addf %53, %55 : vector<16x128xf32>
    %57 = vector.shape_cast %56 : vector<16x128xf32> to vector<1x16x128xf32>
    %c0_18 = arith.constant 0 : index
    %c0_19 = arith.constant 0 : index
    %c0_20 = arith.constant 0 : index
    %58 = vector.load %arg8[%c0_18, %c0_19, %c0_20] : memref<1x16x128xf32, #tpu.memory_space<vmem>>, vector<1x16x128xf32>
    tpu.vector_store %arg8[%c0_18, %c0_19, %c0_20], %57 {strides = array<i32>} : memref<1x16x128xf32, #tpu.memory_space<vmem>>, vector<1x16x128xf32>,
    return
  }
  func.func @transform_0(%arg0: i32, %arg1: i32) -> (i32, i32, i32, i32) {
    %c2_i32 = arith.constant 2 : i32
    %0 = arith.muli %arg0, %c2_i32 : i32
    %1 = arith.addi %0, %arg1 : i32
    %c0_i32 = arith.constant 0 : i32
    %c0_i32_0 = arith.constant 0 : i32
    %c0_i32_1 = arith.constant 0 : i32
    %c0_i32_2 = arith.constant 0 : i32
    return %1, %c0_i32, %c0_i32_0, %c0_i32_1 : i32, i32, i32, i32
  }
  func.func @transform_1(%arg0: i32, %arg1: i32) -> (i32, i32, i32) {
    %c2_i32 = arith.constant 2 : i32
    %0 = arith.muli %arg0, %c2_i32 : i32
    %1 = arith.addi %0, %arg1 : i32
    %c0_i32 = arith.constant 0 : i32
    %c0_i32_0 = arith.constant 0 : i32
    %c0_i32_1 = arith.constant 0 : i32
    return %1, %c0_i32, %c0_i32_0 : i32, i32, i32
  }
  func.func @transform_2(%arg0: i32, %arg1: i32) -> (i32, i32) {
    %c0_i32 = arith.constant 0 : i32
    %c0_i32_0 = arith.constant 0 : i32
    %c0_i32_1 = arith.constant 0 : i32
    return %c0_i32, %c0_i32_0 : i32, i32
  }
  func.func @transform_3(%arg0: i32, %arg1: i32) -> (i32, i32) {
    %c0_i32 = arith.constant 0 : i32
    %c0_i32_0 = arith.constant 0 : i32
    %c0_i32_1 = arith.constant 0 : i32
    return %c0_i32, %c0_i32_0 : i32, i32
  }
  func.func @transform_4(%arg0: i32, %arg1: i32) -> (i32, i32) {
    %c0_i32 = arith.constant 0 : i32
    %c0_i32_0 = arith.constant 0 : i32
    %c0_i32_1 = arith.constant 0 : i32
    return %c0_i32, %c0_i32_0 : i32, i32
  }
  func.func @transform_5(%arg0: i32, %arg1: i32) -> (i32, i32) {
    %c0_i32 = arith.constant 0 : i32
    %c0_i32_0 = arith.constant 0 : i32
    %c0_i32_1 = arith.constant 0 : i32
    return %c0_i32, %c0_i32_0 : i32, i32
  }
  func.func @transform_6(%arg0: i32, %arg1: i32) -> (i32, i32, i32) {
    %c2_i32 = arith.constant 2 : i32
    %0 = arith.muli %arg0, %c2_i32 : i32
    %1 = arith.addi %0, %arg1 : i32
    %c0_i32 = arith.constant 0 : i32
    %c0_i32_0 = arith.constant 0 : i32
    %c0_i32_1 = arith.constant 0 : i32
    return %1, %c0_i32, %c0_i32_0 : i32, i32, i32
  }
}

</mosaic_0001>

<bundles_post_ra>
// kernel: residual_block_nobn.1
= control target key start
LH: loop header
LB: loop body
LE: loop exit
PB: predicated region body
PF: predicated region fallthrough
CT: control target
= control target key end

     0   :  { %s3201_s21 = smov 0   ;;  %s3203_s22 = smov 0   ;;  %s4426_s0 = inlined_call_operand.vmem [shape: f32[4,12,18,16], index: 0, kind: input, shape index: {}]   ;;  %s4427_s1 = inlined_call_operand.vmem [shape: f32[4,16,128], index: 1, kind: input, shape index: {}]   ;;  %s4428_s2 = inlined_call_operand.vmem [shape: f32[144,16], index: 2, kind: input, shape index: {}]   ;;  %s4429_s3 = inlined_call_operand.vmem [shape: f32[1,16], index: 3, kind: input, shape index: {}]   ;;  %s4430_s4 = inlined_call_operand.vmem [shape: f32[16,144], index: 4, kind: input, shape index: {}]   ;;  %s4431_s5 = inlined_call_operand.vmem [shape: f32[16,1], index: 5, kind: input, shape index: {}]   ;;  %s4432_s6 = inlined_call_operand.vmem [shape: f32[4,16,128], index: 6, kind: output, shape index: {}]  }
   0x1   :  { %s3205_s23 = smov 0   ;;  %s3207_s24 = smov 0  }
   0x2   :  { %s3209_s25 = smov 0  }
   0x3 LB: > { %s25_s26 = sadd.s32 1, %s3147_s23  ;;  %s28_s27 = sadd.s32 1, %s3151_s24  ;;  %s3155_s25 = sphi %s3209_s25, %s16_s25   ;;  %s3151_s24 = sphi %s3207_s24, %s4456_s24   ;;  %s3147_s23 = sphi %s3205_s23, %s4455_s23   ;;  %s3143_s22 = sphi %s3203_s22, %s4454_s22   ;;  %s3139_s21 = sphi %s3201_s21, %s4453_s21  }
   0x4   : > { %p26_p0 = scmp.ge.s32.totalorder %s25_s26, 2  ;;  %p2321_p1 = scmp.ge.s32.totalorder %s3155_s25, 1 }
   0x5   : > { %p254_p2 = scmp.lt.s32.totalorder %s3155_s25, 5 }
   0x6   : > { %s4458_s26 = smov (%p26_p0, %s25_s26), 0  ;;  %s4460_s27 = smov (!%p26_p0, %s28_s27), %s3151_s24 }
   0x7   : > { %p255_p3 = pnand %p2321_p1, %p254_p2  ;;  %p30_p4 = scmp.ge.s32.totalorder %s4460_s27, 2 }
   0x8   : > { %s2322_s28 = sshll.u32 (!%p255_p3), %s3143_s22, 1  ;;  %v1083_v0 = vld [vmem:[%s4428_s2] sm:$0xff] (!%p255_p3)  ;;  %v3157_v1 = vmov (!%p255_p3), 0.0|0.0   ;;  %v1084_v2 = vld [vmem:[%s4428_s2 + $0x8] sm:$0xff] (!%p255_p3)  ;;  %v1085_v3 = vld [vmem:[%s4428_s2 + $0x10] sm:$0xff] (!%p255_p3)  ;;  %vm388_vm0 = vcmask (!%p255_p3), 1046528  }
   0x9   : > { %s4462_s27 = smov (%p30_p4, %s4460_s27), 0  ;;  %258 = sbr.rel (%p255_p3) target bundleno = 860 (0x35c), region = 44 }
   0xa   : > { %s296_s7 = sadd.s32 (!%p255_p3), %s3139_s21, %s2322_s28  ;;  %2383 = vmatprep.subr.bf16.mxu0 (!%p255_p3), %v3157_v1  ;;  %v1086_v4 = vld [vmem:[%s4428_s2 + $0x18] sm:$0xff] (!%p255_p3)  ;;  %v2384_v5 = vpack.c.bf16 (!%p255_p3), %v1084_v2, %v1083_v0  ;;  %v1087_v7 = vld [vmem:[%s4428_s2 + $0x20] sm:$0xff] (!%p255_p3)  ;;  %v1088_v8 = vld [vmem:[%s4428_s2 + $0x28] sm:$0xff] (!%p255_p3)  ;;  %vm499_vm1 = vcmask (!%p255_p3), 1045504   ;;  %s3158_s11 = smov (!%p255_p3), 48   ;;  %vm936_vm2 = vcmask (!%p255_p3), 130048  }
   0xb   : > { %p297_p5 = scmp.lt.s32.totalorder (!%p255_p3), %s296_s7, 3  ;;  %v2387_v6 = vpack.c.bf16 (!%p255_p3), %v1086_v4, %v1085_v3  ;;  %v1089_v9 = vld [vmem:[%s4428_s2 + $0x30] sm:$0xff] (!%p255_p3)  ;;  %v1090_v10 = vld [vmem:[%s4428_s2 + $0x38] sm:$0xff] (!%p255_p3)  ;;  %v2390_v11 = vpack.c.bf16 (!%p255_p3), %v1088_v8, %v1087_v7  ;;  %v1091_v27 = vld [vmem:[%s4428_s2 + $0x40] sm:$0xff] (!%p255_p3)  ;;  %s3159_s14 = smov (!%p255_p3), 16   ;;  %vm957_vm3 = vcmask (!%p255_p3), 261120  }
   0xc   : > { %2385 = vmatpush1.bf16.msra.mxu0 (!%p255_p3), %v2384_v5  ;;  %v2393_v21 = vpack.c.bf16 (!%p255_p3), %v1090_v10, %v1089_v9  ;;  %v1092_v33 = vld [vmem:[%s4428_s2 + $0x48] sm:$0xff] (!%p255_p3)  ;;  %s3160_s15 = smov (!%p255_p3), 96   ;;  %v1093_v54 = vld [vmem:[%s4428_s2 + $0x50] sm:$0xff] (!%p255_p3)  ;;  %v1094_v55 = vld [vmem:[%s4428_s2 + $0x58] sm:$0xff] (!%p255_p3)  ;;  %s3161_s20 = smov (!%p255_p3), 32   ;;  %vm978_vm4 = vcmask (!%p255_p3), 392192  }
   0xd   : > { %2386 = vmatprep.subr.bf16.mxu0 (!%p255_p3), %v3157_v1  ;;  %v2396_v44 = vpack.c.bf16 (!%p255_p3), %v1092_v33, %v1091_v27  ;;  %s3162_s22 = smov (!%p255_p3), 64   ;;  %v2399_v61 = vpack.c.bf16 (!%p255_p3), %v1094_v55, %v1093_v54  ;;  %v1095_v62 = vld [vmem:[%s4428_s2 + $0x60] sm:$0xff] (!%p255_p3)  ;;  %v1096_v63 = vld [vmem:[%s4428_s2 + $0x68] sm:$0xff] (!%p255_p3)  ;;  %s3163_s10 = smov (!%p255_p3), 80   ;;  %vm999_vm5 = vcmask (!%p255_p3), 523264   ;;  %vm1020_vm6 = vcmask (!%p255_p3), 654336  }
   0xe   : > { %vm1041_vm7 = vcmask (!%p255_p3), 785408   ;;  %vm1062_vm8 = vcmask (!%p255_p3), 916480   ;;  %vm1442_vm12 = vcmask (!%p255_p3), 1040384  }
  0x10   : > { %s4464_s7 = smov (!%p297_p5, %s296_s7), 3  ;;  %2388 = vmatpush1.bf16.msra.mxu0 %v2387_v6  ;;  %v2402_v6 = vpack.c.bf16 %v1096_v63, %v1095_v62 }
  0x11   : > { %s2450_s18 = smul.u32 288, %s4464_s7  ;;  %2389 = vmatprep.subr.bf16.mxu0 %v3157_v1  ;;  %s2381_s28 = sshll.u32 %s4464_s7, 4 }
  0x13   : > { %s3266_s8 = scalar_lea.vmem %s4426_s0, %s2450_s18  ;;  %s3164_s18 = smov 112  }
  0x14   : > { %v3269_v12 = vld [vmem:[%s3266_s8 + $0x18] sm:$0xff]  ;;  %v3272_v13 = vld [vmem:[%s3266_s8 + $0x20] sm:$0xff]  ;;  %v3281_v16 = vld [vmem:[%s3266_s8 + $0x8] sm:$0xff]  ;;  %2391 = vmatpush1.bf16.msra.mxu0 %v2390_v11 }
  0x15   : > { %v3275_v14 = vld [vmem:[%s3266_s8] sm:$0xff]  ;;  %v2500_v15 = vpack.i.bf16 %v3272_v13, %v3269_v12  ;;  %v324_v17 = vld [vmem:[%s3266_s8 + $0x10] sm:$0x3]  ;;  %v390_v22 = vrot.slane %v3281_v16, 1  ;;  %v3291_v25 = vld [vmem:[%s3266_s8 + $0x38] sm:$0xff]  ;;  %v501_v26 = vrot.slane %v3281_v16, 2  ;;  %2392 = vmatprep.subr.bf16.mxu0 %v3157_v1 }
  0x16   : > { %v389_v18 = vrot.slane %v3275_v14, 1  ;;  %v3286_v19 = vld [vmem:[%s3266_s8 + $0x30] sm:$0xff]  ;;  %v500_v20 = vrot.slane %v3275_v14, 2  ;;  %v392_v23 = vrot.slane %v324_v17, 1  ;;  %v503_v24 = vrot.slane %v324_v17, 2  ;;  %v3346_v2 = vld [vmem:[%s3266_s8 + $0x48] sm:$0xff] }
  0x17   : > { %2501 = vrot.lane.b32.xlu1 %v2500_v15, %s3158_s11  ;;  %v3300_v28 = vpack.i.bf16 %v3291_v25, %v3286_v19  ;;  %v327_v29 = vld [vmem:[%s3266_s8 + $0x28] sm:$0x3]  ;;  %v394_v30 = vrot.slane %v3269_v12, 1  ;;  %v395_v31 = vrot.slane %v3272_v13, 1  ;;  %v505_v32 = vrot.slane %v3269_v12, 2  ;;  %v3349_v3 = vld [vmem:[%s3266_s8 + $0x50] sm:$0xff] }
  0x18   : > { %v391_v34 = vsel %vm388_vm0, %v389_v18, %v390_v22  ;;  %v393_v35 = vsel %vm388_vm0, %v390_v22, %v392_v23  ;;  %v502_v36 = vsel %vm499_vm1, %v500_v20, %v501_v26  ;;  %v504_v37 = vsel %vm499_vm1, %v501_v26, %v503_v24  ;;  %v330_v41 = vld [vmem:[%s3266_s8 + $0x40] sm:$0x3]  ;;  %2394 = vmatpush1.bf16.msra.mxu0 %v2393_v21  ;;  %v333_v4 = vld [vmem:[%s3266_s8 + $0x58] sm:$0x3]  ;;  %v1097_v11 = vld [vmem:[%s4428_s2 + $0x70] sm:$0xff] }
  0x19   : > { %v2510_v38 = vpack.i.bf16 %v393_v35, %v391_v34  ;;  %v396_v39 = vsel %vm388_vm0, %v394_v30, %v395_v31  ;;  %v397_v40 = vrot.slane %v327_v29, 1  ;;  %v506_v42 = vrot.slane %v3272_v13, 2  ;;  %2395 = vmatprep.subr.bf16.mxu0 %v3157_v1  ;;  %v1098_v15 = vld [vmem:[%s4428_s2 + $0x78] sm:$0xff]  ;;  %v3453_v62 = vld [vmem:[%s3266_s8 + $0x90] sm:$0xff] }
  0x1a   : > { %v508_v43 = vrot.slane %v327_v29, 2  ;;  %v2515_v45 = vpack.i.bf16 %v504_v37, %v502_v36  ;;  %v399_v47 = vrot.slane %v3286_v19, 1  ;;  %v400_v48 = vrot.slane %v3291_v25, 1  ;;  %v3390_v29 = vld [vmem:[%s3266_s8 + $0x68] sm:$0xff]  ;;  %v3456_v63 = vld [vmem:[%s3266_s8 + $0x98] sm:$0xff] }
  0x1b   : > { %2511 = vrot.lane.b32.xlu0 %v2510_v38, %s3159_s14  ;;  %2506 = vrot.lane.b32.xlu1 %v3300_v28, %s3160_s15  ;;  %v398_v46 = vsel %vm388_vm0, %v395_v31, %v397_v40  ;;  %v507_v50 = vsel %vm499_vm1, %v505_v32, %v506_v42  ;;  %v402_v52 = vrot.slane %v330_v41, 1  ;;  %v510_v53 = vrot.slane %v3286_v19, 2  ;;  %v1100_v40 = vld [vmem:[%s4428_s2 + $0x88] sm:$0xff] }
  0x1c   : > { %v2520_v49 = vpack.i.bf16 %v398_v46, %v396_v39  ;;  %v509_v51 = vsel %vm499_vm1, %v506_v42, %v508_v43  ;;  %v511_v56 = vrot.slane %v3291_v25, 2  ;;  %v401_v58 = vsel %vm388_vm0, %v399_v47, %v400_v48  ;;  %2397 = vmatpush1.bf16.msra.mxu0 %v2396_v44  ;;  %v1099_v39 = vld [vmem:[%s4428_s2 + $0x80] sm:$0xff]  ;;  %v3420_v44 = vld [vmem:[%s3266_s8 + $0x78] sm:$0xff]  ;;  %v339_v46 = vld [vmem:[%s3266_s8 + $0x88] sm:$0x3] }
  0x1d   : > { %v2525_v57 = vpack.i.bf16 %v509_v51, %v507_v50  ;;  %v403_v59 = vsel %vm388_vm0, %v400_v48, %v402_v52  ;;  %v513_v60 = vrot.slane %v330_v41, 2  ;;  %2398 = vmatprep.subr.bf16.mxu0 %v3157_v1  ;;  %v404_v8 = vrot.slane %v3346_v2, 1 }
  0x1e   : > { %v512_v0 = vsel %vm499_vm1, %v510_v53, %v511_v56  ;;  %v2530_v5 = vpack.i.bf16 %v403_v59, %v401_v58  ;;  %v405_v9 = vrot.slane %v3349_v3, 1  ;;  %v407_v10 = vrot.slane %v333_v4, 1 }
  0x1f   : > { %2516 = vrot.lane.b32.xlu0 %v2515_v45, %s3161_s20  ;;  %2521 = vrot.lane.b32.xlu1 %v2520_v49, %s3162_s22  ;;  %v3357_v7 = vsel %vm499_vm1, %v511_v56, %v513_v60  ;;  %v2405_v21 = vpack.c.bf16 %v1098_v15, %v1097_v11  ;;  %v2560_v23 = vpack.i.bf16 %v3349_v3, %v3346_v2  ;;  %v515_v24 = vrot.slane %v3346_v2, 2  ;;  %v3423_v45 = vld [vmem:[%s3266_s8 + $0x80] sm:$0xff] }
  0x20   : > { %2331 = vmatprep.mubr.msk.f32.mxu0 %vm936_vm2, %v512_v0  ;;  %2400 = vmatpush1.bf16.msra.mxu0 %v2399_v61  ;;  %v2555_v17 = vpack.i.bf16 %v3357_v7, %v512_v0  ;;  %v406_v18 = vsel %vm388_vm0, %v404_v8, %v405_v9  ;;  %v408_v20 = vsel %vm388_vm0, %v405_v9, %v407_v10  ;;  %v516_v26 = vrot.slane %v3349_v3, 2  ;;  %v342_v0 = vld [vmem:[%s3266_s8 + $0xa0] sm:$0x3] }
  0x21   : > { %2401 = vmatprep.subr.bf16.mxu0 %v3157_v1  ;;  %v2565_v22 = vpack.i.bf16 %v408_v20, %v406_v18  ;;  %v518_v27 = vrot.slane %v333_v4, 2  ;;  %v410_v34 = vrot.slane %v3390_v29, 1  ;;  %v521_v38 = vrot.slane %v3390_v29, 2 }
  0x22   : > { %v3399_v32 = vsel %vm499_vm1, %v515_v24, %v516_v26  ;;  %v2408_v47 = vpack.c.bf16 %v1100_v40, %v1099_v39  ;;  %v414_v51 = vrot.slane %v3420_v44, 1  ;;  %v415_v52 = vrot.slane %v3423_v45, 1  ;;  %v345_v24 = vld [vmem:[%s3266_s8 + $0xb8] sm:$0x3] }
  0x23   : > { %2526 = vrot.lane.b32.xlu0 %v2525_v57, %s3163_s10  ;;  %2536 = vrot.lane.b32.xlu1 %v2520_v49, %s3159_s14  ;;  %v3402_v33 = vsel %vm499_vm1, %v516_v26, %v518_v27  ;;  %v417_v53 = vrot.slane %v339_v46, 1  ;;  %v2630_v58 = vpack.i.bf16 %v3423_v45, %v3420_v44  ;;  %v525_v59 = vrot.slane %v3420_v44, 2 }
  0x24   : > { %2403 = vmatpush1.bf16.msra.mxu0 %v2402_v6  ;;  %v2590_v36 = vpack.i.bf16 %v3402_v33, %v3399_v32  ;;  %v416_v55 = vsel %vm388_vm0, %v414_v51, %v415_v52  ;;  %v526_v60 = vrot.slane %v3423_v45, 2  ;;  %v528_v61 = vrot.slane %v339_v46, 2  ;;  %v3516_v46 = vld [vmem:[%s3266_s8 + $0xc8] sm:$0xff] }
  0x25   : > { %2404 = vmatprep.subr.bf16.mxu0 %v3157_v1  ;;  %v418_v56 = vsel %vm388_vm0, %v415_v52, %v417_v53  ;;  %v419_v8 = vrot.slane %v3453_v62, 1  ;;  %v420_v9 = vrot.slane %v3456_v63, 1  ;;  %v422_v10 = vrot.slane %v342_v0, 1 }
  0x26   : > { %v3462_v4 = vsel %vm499_vm1, %v525_v59, %v526_v60  ;;  %v3467_v6 = vsel %vm499_vm1, %v526_v60, %v528_v61  ;;  %v530_v15 = vrot.slane %v3453_v62, 2  ;;  %v531_v20 = vrot.slane %v3456_v63, 2 }
  0x27   : > { %2531 = vrot.lane.b32.xlu0 %v2530_v5, %s3164_s18  ;;  %2546 = vrot.lane.b32.xlu1 %v3300_v28, %s3158_s11  ;;  %v3387_v28 = vld [vmem:[%s3266_s8 + $0x60] sm:$0xff]  ;;  %v2660_v11 = vpack.i.bf16 %v3467_v6, %v3462_v4  ;;  %v423_v18 = vsel %vm388_vm0, %v420_v9, %v422_v10 }
  0x28   : > { %2406 = vmatpush1.bf16.msra.mxu0 %v2405_v21  ;;  %v2595_v30 = vpack.i.bf16 %v3390_v29, %v3387_v28  ;;  %v409_v31 = vrot.slane %v3387_v28, 1  ;;  %v520_v37 = vrot.slane %v3387_v28, 2  ;;  %v533_v21 = vrot.slane %v342_v0, 2  ;;  %v3540_v0 = vld [vmem:[%s3266_s8 + $0xd8] sm:$0xff] }
  0x29   : > { %2407 = vmatprep.subr.bf16.mxu0 %v3157_v1  ;;  %v336_v1 = vld [vmem:[%s3266_s8 + $0x70] sm:$0x3] }
  0x2a   : > { %v412_v35 = vrot.slane %v336_v1, 1  ;;  %v411_v41 = vsel %vm388_vm0, %v409_v31, %v410_v34  ;;  %v523_v43 = vrot.slane %v336_v1, 2  ;;  %v3429_v49 = vsel %vm499_vm1, %v520_v37, %v521_v38 }
  0x2b   : > { %2541 = vrot.lane.b32.xlu0 %v2525_v57, %s3161_s20  ;;  %2556 = vrot.lane.b32.xlu1 %v2555_v17, %s3163_s10  ;;  %v2635_v57 = vpack.i.bf16 %v418_v56, %v416_v55  ;;  %v3490_v1 = vsel %vm499_vm1, %v530_v15, %v531_v20  ;;  %v434_v15 = vrot.slane %v3540_v0, 1 }
  0x2c   : > { %v413_v42 = vsel %vm388_vm0, %v410_v34, %v412_v35  ;;  %v3432_v50 = vsel %vm499_vm1, %v521_v38, %v523_v43  ;;  %2409 = vmatpush1.bf16.msra.mxu0 %v2408_v47  ;;  %v427_v34 = vrot.slane %v345_v24, 1  ;;  %v3513_v43 = vld [vmem:[%s3266_s8 + $0xc0] sm:$0xff]  ;;  %v348_v47 = vld [vmem:[%s3266_s8 + $0xd0] sm:$0x3] }
  0x2d   : > { %v2600_v48 = vpack.i.bf16 %v413_v42, %v411_v41  ;;  %v2625_v54 = vpack.i.bf16 %v3432_v50, %v3429_v49  ;;  %v538_v42 = vrot.slane %v345_v24, 2  ;;  %v429_v51 = vrot.slane %v3513_v43, 1 }
  0x2e   : > { %v432_v55 = vrot.slane %v348_v47, 1  ;;  %v543_v61 = vrot.slane %v348_v47, 2 }
  0x2f   : > { %2551 = vrot.lane.b32.xlu0 %v2530_v5, %s3162_s22  ;;  %2566 = vrot.lane.b32.xlu1 %v2565_v22, %s3164_s18 }
  0x33   : > { %2561 = vrot.lane.b32.xlu0 %v2560_v23, %s3160_s15  ;;  %2576 = vrot.lane.b32.xlu1 %v2555_v17, %s3161_s20  ;;  %v421_v17 = vsel %vm388_vm0, %v419_v8, %v420_v9  ;;  %v351_v8 = vld [vmem:[%s3266_s8 + $0xe8] sm:$0x3] }
  0x34   : > { %v2670_v26 = vpack.i.bf16 %v423_v18, %v421_v17  ;;  %v437_v18 = vrot.slane %v351_v8, 1 }
  0x37   : > { %2571 = vrot.lane.b32.xlu0 %v2530_v5, %s3159_s14  ;;  %2586 = vrot.lane.b32.xlu1 %v2565_v22, %s3162_s22  ;;  %v2665_v5 = vpack.i.bf16 %v3456_v63, %v3453_v62 }
  0x3b   : > { %2581 = vrot.lane.b32.xlu0 %v2560_v23, %s3158_s11  ;;  %2596 = vrot.lane.b32.xlu1 %v2595_v30, %s3160_s15  ;;  %v3483_v23 = vld [vmem:[%s3266_s8 + $0xb0] sm:$0xff] }
  0x3c   : > { %v425_v31 = vrot.slane %v3483_v23, 1  ;;  %v536_v41 = vrot.slane %v3483_v23, 2 }
  0x3e   : > { %v428_v37 = vsel %vm388_vm0, %v425_v31, %v427_v34  ;;  %v3528_v53 = vsel %vm499_vm1, %v536_v41, %v538_v42 }
  0x3f   : > { %2591 = vrot.lane.b32.xlu0 %v2590_v36, %s3163_s10  ;;  %2606 = vrot.lane.b32.xlu1 %v2565_v22, %s3159_s14  ;;  %v3480_v22 = vld [vmem:[%s3266_s8 + $0xa8] sm:$0xff] }
  0x40   : > { %v424_v27 = vrot.slane %v3480_v22, 1  ;;  %v2700_v39 = vpack.i.bf16 %v3483_v23, %v3480_v22  ;;  %v535_v40 = vrot.slane %v3480_v22, 2 }
  0x42   : > { %v3525_v52 = vsel %vm499_vm1, %v535_v40, %v536_v41 }
  0x43   : > { %2601 = vrot.lane.b32.xlu0 %v2600_v48, %s3164_s18  ;;  %2616 = vrot.lane.b32.xlu1 %v2595_v30, %s3158_s11  ;;  %v3493_v30 = vsel %vm499_vm1, %v531_v20, %v533_v21  ;;  %v2730_v56 = vpack.i.bf16 %v3528_v53, %v3525_v52 }
  0x44   : > { %v2695_v35 = vpack.i.bf16 %v3493_v30, %v3490_v1 }
  0x47   : > { %2611 = vrot.lane.b32.xlu0 %v2590_v36, %s3161_s20  ;;  %2626 = vrot.lane.b32.xlu1 %v2625_v54, %s3163_s10  ;;  %v426_v36 = vsel %vm388_vm0, %v424_v27, %v425_v31  ;;  %v545_v31 = vrot.slane %v3540_v0, 2 }
  0x48   : > { %v2705_v38 = vpack.i.bf16 %v428_v37, %v426_v36  ;;  %v352_v36 = vld [vmem:[%s3266_s8 + $0xf0] sm:$0xff]  ;;  %v3574_v37 = vld [vmem:[%s3266_s8 + $0xf8] sm:$0xff] }
  0x49   : > { %v2805_v41 = vpack.i.bf16 %v3574_v37, %v352_v36  ;;  %v673_v47 = vrot.slane %v352_v36, 1 }
  0x4b   : > { %2621 = vrot.lane.b32.xlu0 %v2600_v48, %s3162_s22  ;;  %2636 = vrot.lane.b32.xlu1 %v2635_v57, %s3164_s18 }
  0x4f   : > { %2631 = vrot.lane.b32.xlu0 %v2630_v58, %s3160_s15  ;;  %2646 = vrot.lane.b32.xlu1 %v2625_v54, %s3161_s20  ;;  %v430_v54 = vrot.slane %v3516_v46, 1 }
  0x51   : > { %v431_v59 = vsel %vm388_vm0, %v429_v51, %v430_v54  ;;  %v433_v60 = vsel %vm388_vm0, %v430_v54, %v432_v55 }
  0x52   : > { %v2740_v9 = vpack.i.bf16 %v433_v60, %v431_v59 }
  0x53   : > { %2641 = vrot.lane.b32.xlu0 %v2600_v48, %s3159_s14  ;;  %2656 = vrot.lane.b32.xlu1 %v2635_v57, %s3162_s22  ;;  %v2735_v48 = vpack.i.bf16 %v3516_v46, %v3513_v43 }
  0x57   : > { %2651 = vrot.lane.b32.xlu0 %v2630_v58, %s3158_s11  ;;  %2666 = vrot.lane.b32.xlu1 %v2665_v5, %s3160_s15  ;;  %v541_v58 = vrot.slane %v3516_v46, 2 }
  0x5b   : > { %2661 = vrot.lane.b32.xlu0 %v2660_v11, %s3163_s10  ;;  %2676 = vrot.lane.b32.xlu1 %v2635_v57, %s3159_s14  ;;  %v540_v57 = vrot.slane %v3513_v43, 2 }
  0x5d   : > { %v3549_v10 = vsel %vm499_vm1, %v540_v57, %v541_v58 }
  0x5f   : > { %2671 = vrot.lane.b32.xlu0 %v2670_v26, %s3164_s18  ;;  %2686 = vrot.lane.b32.xlu1 %v2665_v5, %s3158_s11  ;;  %v3543_v5 = vld [vmem:[%s3266_s8 + $0xe0] sm:$0xff] }
  0x60   : > { %v435_v17 = vrot.slane %v3543_v5, 1  ;;  %v2770_v27 = vpack.i.bf16 %v3543_v5, %v3540_v0  ;;  %v546_v34 = vrot.slane %v3543_v5, 2 }
  0x62   : > { %v436_v21 = vsel %vm388_vm0, %v434_v15, %v435_v17  ;;  %v438_v24 = vsel %vm388_vm0, %v435_v17, %v437_v18  ;;  %v3580_v40 = vsel %vm499_vm1, %v545_v31, %v546_v34 }
  0x63   : > { %2681 = vrot.lane.b32.xlu0 %v2660_v11, %s3161_s20  ;;  %2696 = vrot.lane.b32.xlu1 %v2695_v35, %s3163_s10  ;;  %v3552_v11 = vsel %vm499_vm1, %v541_v58, %v543_v61 }
  0x64   : > { %v2765_v20 = vpack.i.bf16 %v3552_v11, %v3549_v10 }
  0x67   : > { %2691 = vrot.lane.b32.xlu0 %v2670_v26, %s3162_s22  ;;  %2706 = vrot.lane.b32.xlu1 %v2705_v38, %s3164_s18 }
  0x6b   : > { %2701 = vrot.lane.b32.xlu0 %v2700_v39, %s3160_s15  ;;  %2716 = vrot.lane.b32.xlu1 %v2695_v35, %s3161_s20  ;;  %v548_v35 = vrot.slane %v351_v8, 2 }
  0x6d   : > { %v3586_v42 = vsel %vm499_vm1, %v546_v34, %v548_v35 }
  0x6f   : > { %2711 = vrot.lane.b32.xlu0 %v2670_v26, %s3159_s14  ;;  %2726 = vrot.lane.b32.xlu1 %v2705_v38, %s3162_s22  ;;  %v2775_v26 = vpack.i.bf16 %v438_v24, %v436_v21 }
  0x73   : > { %2721 = vrot.lane.b32.xlu0 %v2700_v39, %s3158_s11  ;;  %2736 = vrot.lane.b32.xlu1 %v2735_v48, %s3160_s15 }
  0x77   : > { %2731 = vrot.lane.b32.xlu0 %v2730_v56, %s3163_s10  ;;  %2746 = vrot.lane.b32.xlu1 %v2705_v38, %s3159_s14  ;;  %v3577_v38 = vld [vmem:[%s3266_s8 + $0x100] sm:$0x3] }
  0x78   : > { %v676_v51 = vrot.slane %v3577_v38, 1 }
  0x7b   : > { %2741 = vrot.lane.b32.xlu0 %v2740_v9, %s3164_s18  ;;  %2756 = vrot.lane.b32.xlu1 %v2735_v48, %s3158_s11  ;;  %v674_v48 = vrot.slane %v3574_v37, 1 }
  0x7d   : > { %v675_v59 = vsel %vm388_vm0, %v673_v47, %v674_v48  ;;  %v677_v60 = vsel %vm388_vm0, %v674_v48, %v676_v51  ;;  %v739_v47 = vrot.slane %v3574_v37, 2  ;;  %v3608_v48 = vld [vmem:[%s3266_s8 + $0x108] sm:$0xff] }
  0x7e   : > { %v2810_v18 = vpack.i.bf16 %v677_v60, %v675_v59 }
  0x7f   : > { %2751 = vrot.lane.b32.xlu0 %v2730_v56, %s3161_s20  ;;  %2766 = vrot.lane.b32.xlu1 %v2765_v20, %s3163_s10  ;;  %v2800_v56 = vpack.i.bf16 %v3586_v42, %v3580_v40 }
  0x83   : > { %2761 = vrot.lane.b32.xlu0 %v2740_v9, %s3162_s22  ;;  %2776 = vrot.lane.b32.xlu1 %v2775_v26, %s3164_s18 }
  0x87   : > { %2771 = vrot.lane.b32.xlu0 %v2770_v27, %s3160_s15  ;;  %2786 = vrot.lane.b32.xlu1 %v2765_v20, %s3161_s20 }
  0x89   : > { %v2502_v39 = vpop.permute.xlu1 %2501 }
  0x8a   : > { %v2503_v20 = vunpack.i.l.bf16 %v2502_v39  ;;  %v2504_v31 = vunpack.i.h.bf16 %v2502_v39 }
  0x8b   : > { %2781 = vrot.lane.b32.xlu0 %v2740_v9, %s3159_s14  ;;  %2796 = vrot.lane.b32.xlu1 %v2775_v26, %s3162_s22 }
  0x8d   : > { %v2512_v54 = vpop.permute.xlu0 %2511  ;;  %v3590_v55 = vpop.permute.xlu1 %2506 }
  0x8e   : > { %v2514_v57 = vunpack.i.h.bf16 %v2512_v54  ;;  %v2513_v58 = vunpack.i.l.bf16 %v2512_v54 }
  0x8f   : > { %2791 = vrot.lane.b32.xlu0 %v2770_v27, %s3158_s11  ;;  %2806 = vrot.lane.b32.xlu1 %v2805_v41, %s3160_s15  ;;  %v738_v27 = vrot.slane %v352_v36, 2 }
  0x90   : > { %v938_v21 = vsel %vm936_vm2, %v3281_v16, %v2514_v57  ;;  %v937_v24 = vsel %vm936_vm2, %v3275_v14, %v2513_v58  ;;  %v3612_v14 = vld [vmem:[%s3266_s8 + $0x110] sm:$0xff]  ;;  %v866_v58 = vrot.slane %v3608_v48, 1 }
  0x91   : > { %v2517_v61 = vpop.permute.xlu0 %2516  ;;  %v2522_v8 = vpop.permute.xlu1 %2521 }
  0x92   : > { %v2519_v9 = vunpack.i.h.bf16 %v2517_v61  ;;  %v2518_v15 = vunpack.i.l.bf16 %v2517_v61  ;;  %v2523_v17 = vunpack.i.l.bf16 %v2522_v8  ;;  %v2524_v51 = vunpack.i.h.bf16 %v2522_v8 }
  0x93   : > { %2801 = vrot.lane.b32.xlu0 %v2800_v56, %s3163_s10  ;;  %2816 = vrot.lane.b32.xlu1 %v2775_v26, %s3159_s14  ;;  %v3623_v61 = vsel %vm499_vm1, %v738_v27, %v739_v47  ;;  %v867_v8 = vrot.slane %v3612_v14, 1 }
  0x94   : > { %v958_v34 = vsel %vm957_vm3, %v937_v24, %v2518_v15  ;;  %v959_v35 = vsel %vm957_vm3, %v938_v21, %v2519_v9  ;;  %v2508_v9 = vunpack.i.l.bf16 %v3590_v55 }
  0x95   : > { %v979_v16 = vsel %vm978_vm4, %v958_v34, %v2503_v20  ;;  %v2527_v54 = vpop.permute.xlu0 %2526  ;;  %v2537_v57 = vpop.permute.xlu1 %2536  ;;  %v980_v26 = vsel %vm978_vm4, %v959_v35, %v2504_v31 }
  0x96   : > { %v1000_v36 = vsel %vm999_vm5, %v979_v16, %v2523_v17  ;;  %v2528_v39 = vunpack.i.l.bf16 %v2527_v54  ;;  %v2529_v59 = vunpack.i.h.bf16 %v2527_v54  ;;  %v1001_v15 = vsel %vm999_vm5, %v980_v26, %v2524_v51 }
  0x97   : > { %2811 = vrot.lane.b32.xlu0 %v2810_v18, %s3164_s18  ;;  %2826 = vrot.lane.b32.xlu1 %v2805_v41, %s3158_s11  ;;  %v2538_v20 = vunpack.i.l.bf16 %v2537_v57  ;;  %v2539_v24 = vunpack.i.h.bf16 %v2537_v57  ;;  %v868_v51 = vsel %vm388_vm0, %v866_v58, %v867_v8  ;;  %v2509_v16 = vunpack.i.h.bf16 %v3590_v55 }
  0x98   : > { %v1021_v60 = vsel %vm1020_vm6, %v1000_v36, %v2528_v39  ;;  %v1022_v35 = vsel %vm1020_vm6, %v1001_v15, %v2529_v59 }
  0x99   : > { %v2532_v17 = vpop.permute.xlu0 %2531  ;;  %v2547_v41 = vpop.permute.xlu1 %2546  ;;  %v1042_v31 = vsel %vm1041_vm7, %v1021_v60, %v2508_v9  ;;  %v939_v54 = vsel %vm936_vm2, %v3269_v12, %v2538_v20  ;;  %v940_v39 = vsel %vm936_vm2, %v3272_v13, %v2539_v24  ;;  %v1043_v55 = vsel %vm1041_vm7, %v1022_v35, %v2509_v16 }
  0x9a   : > { %v2533_v21 = vunpack.i.l.bf16 %v2532_v17  ;;  %v2534_v27 = vunpack.i.h.bf16 %v2532_v17  ;;  %v2548_v59 = vunpack.i.l.bf16 %v2547_v41  ;;  %v741_v60 = vrot.slane %v3577_v38, 2  ;;  %v3649_v17 = vld [vmem:[%s3266_s8 + $0x118] sm:$0x3]  ;;  %s2351_s8 = sshll.u32 %s3139_s21, 3  ;;  %s319_s21 = scalar_lea.vmem %s4432_s6, %s2381_s28 }
  0x9b   : > { %2821 = vrot.lane.b32.xlu0 %v2800_v56, %s3161_s20  ;;  %779 = vrot.lane.b32.xlu1 %v3623_v61, %s3163_s10  ;;  %v2549_v9 = vunpack.i.h.bf16 %v2547_v41 }
  0x9c   : > { %v1063_v34 = vsel %vm1062_vm8, %v1042_v31, %v2533_v21  ;;  %v1064_v58 = vsel %vm1062_vm8, %v1043_v55, %v2534_v27  ;;  %v3663_v41 = vsel %vm499_vm1, %v739_v47, %v741_v60  ;;  %v869_v31 = vrot.slane %v3649_v17, 1 }
  0x9d   : > { %v2542_v57 = vpop.permute.xlu0 %2541  ;;  %1213 = vmatmul.mubr.f32.vlgmr.msra.gmra.mrb[0].mxu0 %v1063_v34  ;;  %v2557_v56 = vpop.permute.xlu1 %2556 }
  0x9e   : > { %v2544_v26 = vunpack.i.h.bf16 %v2542_v57  ;;  %v2543_v36 = vunpack.i.l.bf16 %v2542_v57  ;;  %2332 = vmatprep.mubr.msk.f32.mxu0 %vm936_vm2, %v3357_v7  ;;  %v2558_v24 = vunpack.i.l.bf16 %v2557_v56  ;;  %v2559_v27 = vunpack.i.h.bf16 %v2557_v56 }
  0x9f   : > { %2831 = vrot.lane.b32.xlu0 %v2810_v18, %s3162_s22  ;;  %907 = vrot.lane.b32.xlu1 %v868_v51, %s3164_s18 }
  0xa0   : > { %v960_v12 = vsel %vm957_vm3, %v939_v54, %v2543_v36  ;;  %v961_v13 = vsel %vm957_vm3, %v940_v39, %v2544_v26  ;;  %v870_v26 = vsel %vm388_vm0, %v867_v8, %v869_v31 }
  0xa1   : > { %v2552_v15 = vpop.permute.xlu0 %2551  ;;  %1218 = vmatmul.mubr.f32.gmra.mrb[2].mxu0 %v1064_v58  ;;  %v2567_v7 = vpop.permute.xlu1 %2566  ;;  %v981_v21 = vsel %vm978_vm4, %v960_v12, %v2548_v59 }
  0xa2   : > { %v2554_v20 = vunpack.i.h.bf16 %v2552_v15  ;;  %v2553_v18 = vunpack.i.l.bf16 %v2552_v15  ;;  %2333 = vmatprep.mubr.msk.f32.mxu0 %vm936_vm2, %v3399_v32  ;;  %v982_v32 = vsel %vm978_vm4, %v961_v13, %v2549_v9  ;;  %v2568_v35 = vunpack.i.l.bf16 %v2567_v7 }
  0xa3   : > { %841 = vrot.lane.b32.xlu0 %v3608_v48, %s3160_s15  ;;  %843 = vrot.lane.b32.xlu1 %v3612_v14, %s3160_s15  ;;  %v2569_v36 = vunpack.i.h.bf16 %v2567_v7 }
  0xa4   : > { %v1002_v38 = vsel %vm999_vm5, %v981_v21, %v2553_v18  ;;  %v1003_v16 = vsel %vm999_vm5, %v982_v32, %v2554_v20 }
  0xa5   : > { %v2562_v34 = vpop.permute.xlu0 %2561  ;;  %v2577_v51 = vpop.permute.xlu1 %2576  ;;  %v1023_v37 = vsel %vm1020_vm6, %v1002_v38, %v2558_v24  ;;  %v1024_v55 = vsel %vm1020_vm6, %v1003_v16, %v2559_v27 }
  0xa6   : > { %v2564_v54 = vunpack.i.h.bf16 %v2562_v34  ;;  %v2563_v57 = vunpack.i.l.bf16 %v2562_v34  ;;  %v2578_v60 = vunpack.i.l.bf16 %v2577_v51  ;;  %v2579_v18 = vunpack.i.h.bf16 %v2577_v51 }
  0xa7   : > { %781 = vrot.lane.b32.xlu0 %v3663_v41, %s3163_s10 }
  0xa8   : > { %v1044_v47 = vsel %vm1041_vm7, %v1023_v37, %v2563_v57  ;;  %v1045_v58 = vsel %vm1041_vm7, %v1024_v55, %v2564_v54 }
  0xa9   : > { %v2572_v39 = vpop.permute.xlu0 %2571  ;;  %v1065_v56 = vsel %vm1062_vm8, %v1044_v47, %v2568_v35  ;;  %v2587_v59 = vpop.permute.xlu1 %2586  ;;  %v1066_v7 = vsel %vm1062_vm8, %v1045_v58, %v2569_v36 }
  0xaa   : > { %v2573_v12 = vunpack.i.l.bf16 %v2572_v39  ;;  %1223 = vmatmul.mubr.f32.gmra.mrb[4].mxu0 %v1065_v56  ;;  %v2574_v9 = vunpack.i.h.bf16 %v2572_v39  ;;  %v2588_v24 = vunpack.i.l.bf16 %v2587_v59  ;;  %v2589_v35 = vunpack.i.h.bf16 %v2587_v59 }
  0xab   : > { %909 = vrot.lane.b32.xlu0 %v870_v26, %s3164_s18  ;;  %2334 = vmatprep.mubr.msk.f32.mxu0 %vm936_vm2, %v3402_v33 }
  0xac   : > { %v941_v8 = vsel %vm936_vm2, %v3286_v19, %v2573_v12  ;;  %v942_v33 = vsel %vm936_vm2, %v3291_v25, %v2574_v9 }
  0xad   : > { %v2582_v15 = vpop.permute.xlu0 %2581  ;;  %v2597_v13 = vpop.permute.xlu1 %2596  ;;  %v962_v21 = vsel %vm957_vm3, %v941_v8, %v2578_v60  ;;  %v963_v34 = vsel %vm957_vm3, %v942_v33, %v2579_v18 }
  0xae   : > { %v2583_v20 = vunpack.i.l.bf16 %v2582_v15  ;;  %1228 = vmatmul.mubr.f32.gmra.mrb[6].mxu0 %v1066_v7  ;;  %v2584_v38 = vunpack.i.h.bf16 %v2582_v15  ;;  %v2598_v16 = vunpack.i.l.bf16 %v2597_v13  ;;  %v2599_v39 = vunpack.i.h.bf16 %v2597_v13 }
  0xaf   : > { %2335 = vmatprep.mubr.msk.f32.mxu0 %vm936_vm2, %v3429_v49 }
  0xb0   : > { %v983_v31 = vsel %vm978_vm4, %v962_v21, %v2583_v20  ;;  %v984_v54 = vsel %vm978_vm4, %v963_v34, %v2584_v38 }
  0xb1   : > { %v2592_v19 = vpop.permute.xlu0 %2591  ;;  %v2607_v32 = vpop.permute.xlu1 %2606  ;;  %v1004_v51 = vsel %vm999_vm5, %v983_v31, %v2588_v24  ;;  %v1005_v36 = vsel %vm999_vm5, %v984_v54, %v2589_v35 }
  0xb2   : > { %v2593_v27 = vunpack.i.l.bf16 %v2592_v19  ;;  %v2594_v57 = vunpack.i.h.bf16 %v2592_v19  ;;  %v2608_v47 = vunpack.i.l.bf16 %v2607_v32  ;;  %v2609_v56 = vunpack.i.h.bf16 %v2607_v32 }
  0xb4   : > { %v1025_v49 = vsel %vm1020_vm6, %v1004_v51, %v2593_v27  ;;  %v1026_v58 = vsel %vm1020_vm6, %v1005_v36, %v2594_v57  ;;  %v943_v60 = vsel %vm936_vm2, %v3346_v2, %v2608_v47  ;;  %v944_v13 = vsel %vm936_vm2, %v3349_v3, %v2609_v56 }
  0xb5   : > { %v2602_v37 = vpop.permute.xlu0 %2601  ;;  %v2617_v25 = vpop.permute.xlu1 %2616  ;;  %v1046_v55 = vsel %vm1041_vm7, %v1025_v49, %v2598_v16  ;;  %v1047_v18 = vsel %vm1041_vm7, %v1026_v58, %v2599_v39 }
  0xb6   : > { %v2603_v26 = vunpack.i.l.bf16 %v2602_v37  ;;  %v2604_v12 = vunpack.i.h.bf16 %v2602_v37  ;;  %v2618_v20 = vunpack.i.l.bf16 %v2617_v25  ;;  %v2619_v33 = vunpack.i.h.bf16 %v2617_v25 }
  0xb8   : > { %v1067_v59 = vsel %vm1062_vm8, %v1046_v55, %v2603_v26  ;;  %v1068_v24 = vsel %vm1062_vm8, %v1047_v18, %v2604_v12 }
  0xb9   : > { %v2612_v9 = vpop.permute.xlu0 %2611  ;;  %1233 = vmatmul.mubr.f32.gmra.mrb[8].mxu0 %v1067_v59  ;;  %v2627_v8 = vpop.permute.xlu1 %2626 }
  0xba   : > { %v2614_v15 = vunpack.i.h.bf16 %v2612_v9  ;;  %v2613_v7 = vunpack.i.l.bf16 %v2612_v9  ;;  %2336 = vmatprep.mubr.msk.f32.mxu0 %vm936_vm2, %v3432_v50  ;;  %v2628_v50 = vunpack.i.l.bf16 %v2627_v8  ;;  %v2629_v35 = vunpack.i.h.bf16 %v2627_v8 }
  0xbc   : > { %v964_v21 = vsel %vm957_vm3, %v943_v60, %v2613_v7  ;;  %v965_v31 = vsel %vm957_vm3, %v944_v13, %v2614_v15 }
  0xbd   : > { %v2622_v2 = vpop.permute.xlu0 %2621  ;;  %1238 = vmatmul.mubr.f32.gmra.mrb[10].mxu0 %v1068_v24  ;;  %v2637_v38 = vpop.permute.xlu1 %2636  ;;  %v985_v3 = vsel %vm978_vm4, %v964_v21, %v2618_v20  ;;  %v986_v34 = vsel %vm978_vm4, %v965_v31, %v2619_v33 }
  0xbe   : > { %v2624_v19 = vunpack.i.h.bf16 %v2622_v2  ;;  %v2623_v32 = vunpack.i.l.bf16 %v2622_v2  ;;  %2337 = vmatprep.mubr.msk.f32.mxu0 %vm936_vm2, %v3462_v4  ;;  %v2638_v16 = vunpack.i.l.bf16 %v2637_v38  ;;  %v2639_v4 = vunpack.i.h.bf16 %v2637_v38 }
  0xc0   : > { %v1006_v27 = vsel %vm999_vm5, %v985_v3, %v2623_v32  ;;  %v1007_v57 = vsel %vm999_vm5, %v986_v34, %v2624_v19 }
  0xc1   : > { %v2632_v51 = vpop.permute.xlu0 %2631  ;;  %v2647_v54 = vpop.permute.xlu1 %2646  ;;  %v1027_v47 = vsel %vm1020_vm6, %v1006_v27, %v2628_v50  ;;  %v1028_v56 = vsel %vm1020_vm6, %v1007_v57, %v2629_v35 }
  0xc2   : > { %v2634_v49 = vunpack.i.h.bf16 %v2632_v51  ;;  %v2633_v37 = vunpack.i.l.bf16 %v2632_v51  ;;  %v2648_v59 = vunpack.i.l.bf16 %v2647_v54  ;;  %v2649_v13 = vunpack.i.h.bf16 %v2647_v54 }
  0xc4   : > { %v1048_v25 = vsel %vm1041_vm7, %v1027_v47, %v2633_v37  ;;  %v1049_v12 = vsel %vm1041_vm7, %v1028_v56, %v2634_v49 }
  0xc5   : > { %v2642_v26 = vpop.permute.xlu0 %2641  ;;  %v1069_v36 = vsel %vm1062_vm8, %v1048_v25, %v2638_v16  ;;  %v2657_v39 = vpop.permute.xlu1 %2656  ;;  %v1070_v8 = vsel %vm1062_vm8, %v1049_v12, %v2639_v4 }
  0xc6   : > { %v2643_v55 = vunpack.i.l.bf16 %v2642_v26  ;;  %1243 = vmatmul.mubr.f32.gmra.mrb[12].mxu0 %v1069_v36  ;;  %v2644_v58 = vunpack.i.h.bf16 %v2642_v26  ;;  %v2658_v18 = vunpack.i.l.bf16 %v2657_v39  ;;  %v2659_v31 = vunpack.i.h.bf16 %v2657_v39 }
  0xc7   : > { %2338 = vmatprep.mubr.msk.f32.mxu0 %vm936_vm2, %v3467_v6 }
  0xc8   : > { %v945_v60 = vsel %vm936_vm2, %v3387_v28, %v2643_v55  ;;  %v946_v6 = vsel %vm936_vm2, %v3390_v29, %v2644_v58 }
  0xc9   : > { %v2652_v9 = vpop.permute.xlu0 %2651  ;;  %v2667_v15 = vpop.permute.xlu1 %2666  ;;  %v966_v20 = vsel %vm957_vm3, %v945_v60, %v2648_v59  ;;  %v967_v38 = vsel %vm957_vm3, %v946_v6, %v2649_v13 }
  0xca   : > { %v2653_v7 = vunpack.i.l.bf16 %v2652_v9  ;;  %1248 = vmatmul.mubr.f32.gmra.mrb[14].mxu0 %v1070_v8  ;;  %v2654_v21 = vunpack.i.h.bf16 %v2652_v9  ;;  %v2668_v32 = vunpack.i.l.bf16 %v2667_v15  ;;  %v2669_v16 = vunpack.i.h.bf16 %v2667_v15 }
  0xcb   : > { %2339 = vmatprep.mubr.msk.f32.mxu0 %vm936_vm2, %v3490_v1 }
  0xcc   : > { %v987_v24 = vsel %vm978_vm4, %v966_v20, %v2653_v7  ;;  %v988_v3 = vsel %vm978_vm4, %v967_v38, %v2654_v21 }
  0xcd   : > { %v2662_v28 = vpop.permute.xlu0 %2661  ;;  %v2677_v33 = vpop.permute.xlu1 %2676  ;;  %v1008_v19 = vsel %vm999_vm5, %v987_v24, %v2658_v18  ;;  %v1009_v51 = vsel %vm999_vm5, %v988_v3, %v2659_v31 }
  0xce   : > { %v2663_v2 = vunpack.i.l.bf16 %v2662_v28  ;;  %v2664_v50 = vunpack.i.h.bf16 %v2662_v28  ;;  %v2678_v34 = vunpack.i.l.bf16 %v2677_v33  ;;  %v2679_v54 = vunpack.i.h.bf16 %v2677_v33 }
  0xd0   : > { %v1029_v1 = vsel %vm1020_vm6, %v1008_v19, %v2663_v2  ;;  %v1030_v47 = vsel %vm1020_vm6, %v1009_v51, %v2664_v50  ;;  %v947_v25 = vsel %vm936_vm2, %v3420_v44, %v2678_v34  ;;  %v948_v56 = vsel %vm936_vm2, %v3423_v45, %v2679_v54 }
  0xd1   : > { %v2672_v27 = vpop.permute.xlu0 %2671  ;;  %v2687_v29 = vpop.permute.xlu1 %2686  ;;  %v1050_v57 = vsel %vm1041_vm7, %v1029_v1, %v2668_v32  ;;  %v1051_v12 = vsel %vm1041_vm7, %v1030_v47, %v2669_v16 }
  0xd2   : > { %v2673_v35 = vunpack.i.l.bf16 %v2672_v27  ;;  %v2674_v49 = vunpack.i.h.bf16 %v2672_v27  ;;  %v2688_v55 = vunpack.i.l.bf16 %v2687_v29  ;;  %v2689_v60 = vunpack.i.h.bf16 %v2687_v29 }
  0xd4   : > { %v1071_v37 = vsel %vm1062_vm8, %v1050_v57, %v2673_v35  ;;  %v1072_v58 = vsel %vm1062_vm8, %v1051_v12, %v2674_v49 }
  0xd5   : > { %v2682_v4 = vpop.permute.xlu0 %2681  ;;  %1253 = vmatmul.mubr.f32.gmra.mrb[16].mxu0 %v1071_v37  ;;  %v2697_v26 = vpop.permute.xlu1 %2696 }
  0xd6   : > { %v2684_v36 = vunpack.i.h.bf16 %v2682_v4  ;;  %v2683_v39 = vunpack.i.l.bf16 %v2682_v4  ;;  %2340 = vmatprep.mubr.msk.f32.mxu0 %vm936_vm2, %v3493_v30  ;;  %v2698_v30 = vunpack.i.l.bf16 %v2697_v26  ;;  %v2699_v18 = vunpack.i.h.bf16 %v2697_v26 }
  0xd8   : > { %v968_v59 = vsel %vm957_vm3, %v947_v25, %v2683_v39  ;;  %v969_v8 = vsel %vm957_vm3, %v948_v56, %v2684_v36 }
  0xd9   : > { %v2692_v44 = vpop.permute.xlu0 %2691  ;;  %1258 = vmatmul.mubr.f32.gmra.mrb[18].mxu0 %v1072_v58  ;;  %v2707_v9 = vpop.permute.xlu1 %2706  ;;  %v989_v45 = vsel %vm978_vm4, %v968_v59, %v2688_v55  ;;  %v990_v20 = vsel %vm978_vm4, %v969_v8, %v2689_v60 }
  0xda   : > { %v2694_v15 = vunpack.i.h.bf16 %v2692_v44  ;;  %v2693_v7 = vunpack.i.l.bf16 %v2692_v44  ;;  %2341 = vmatprep.mubr.msk.f32.mxu0 %vm936_vm2, %v3525_v52  ;;  %v2708_v21 = vunpack.i.l.bf16 %v2707_v9  ;;  %v2709_v52 = vunpack.i.h.bf16 %v2707_v9 }
  0xdc   : > { %v1010_v13 = vsel %vm999_vm5, %v989_v45, %v2693_v7  ;;  %v1011_v28 = vsel %vm999_vm5, %v990_v20, %v2694_v15 }
  0xdd   : > { %v2702_v6 = vpop.permute.xlu0 %2701  ;;  %v2717_v24 = vpop.permute.xlu1 %2716  ;;  %v1031_v38 = vsel %vm1020_vm6, %v1010_v13, %v2698_v30  ;;  %v1032_v50 = vsel %vm1020_vm6, %v1011_v28, %v2699_v18 }
  0xde   : > { %v2704_v33 = vunpack.i.h.bf16 %v2702_v6  ;;  %v2703_v2 = vunpack.i.l.bf16 %v2702_v6  ;;  %v2718_v34 = vunpack.i.l.bf16 %v2717_v24  ;;  %v2719_v49 = vunpack.i.h.bf16 %v2717_v24 }
  0xe0   : > { %v1052_v31 = vsel %vm1041_vm7, %v1031_v38, %v2703_v2  ;;  %v1053_v27 = vsel %vm1041_vm7, %v1032_v50, %v2704_v33 }
  0xe1   : > { %v2712_v19 = vpop.permute.xlu0 %2711  ;;  %v1073_v32 = vsel %vm1062_vm8, %v1052_v31, %v2708_v21  ;;  %v2727_v3 = vpop.permute.xlu1 %2726  ;;  %v1074_v16 = vsel %vm1062_vm8, %v1053_v27, %v2709_v52 }
  0xe2   : > { %v2713_v1 = vunpack.i.l.bf16 %v2712_v19  ;;  %1263 = vmatmul.mubr.f32.gmra.mrb[20].mxu0 %v1073_v32  ;;  %v2714_v29 = vunpack.i.h.bf16 %v2712_v19  ;;  %v2728_v47 = vunpack.i.l.bf16 %v2727_v3  ;;  %v2729_v56 = vunpack.i.h.bf16 %v2727_v3 }
  0xe3   : > { %2342 = vmatprep.mubr.msk.f32.mxu0 %vm936_vm2, %v3528_v53 }
  0xe4   : > { %v949_v35 = vsel %vm936_vm2, %v3453_v62, %v2713_v1  ;;  %v950_v53 = vsel %vm936_vm2, %v3456_v63, %v2714_v29 }
  0xe5   : > { %v2722_v51 = vpop.permute.xlu0 %2721  ;;  %v2737_v54 = vpop.permute.xlu1 %2736  ;;  %v970_v37 = vsel %vm957_vm3, %v949_v35, %v2718_v34  ;;  %v971_v39 = vsel %vm957_vm3, %v950_v53, %v2719_v49 }
  0xe6   : > { %v2723_v57 = vunpack.i.l.bf16 %v2722_v51  ;;  %1268 = vmatmul.mubr.f32.gmra.mrb[22].mxu0 %v1074_v16  ;;  %v2724_v25 = vunpack.i.h.bf16 %v2722_v51  ;;  %v2738_v12 = vunpack.i.l.bf16 %v2737_v54  ;;  %v2739_v15 = vunpack.i.h.bf16 %v2737_v54 }
  0xe7   : > { %2343 = vmatprep.mubr.msk.f32.mxu0 %vm936_vm2, %v3549_v10 }
  0xe8   : > { %v991_v4 = vsel %vm978_vm4, %v970_v37, %v2723_v57  ;;  %v992_v59 = vsel %vm978_vm4, %v971_v39, %v2724_v25 }
  0xe9   : > { %v2732_v62 = vpop.permute.xlu0 %2731  ;;  %v2747_v26 = vpop.permute.xlu1 %2746  ;;  %v1012_v55 = vsel %vm999_vm5, %v991_v4, %v2728_v47  ;;  %v1013_v8 = vsel %vm999_vm5, %v992_v59, %v2729_v56 }
  0xea   : > { %v2733_v36 = vunpack.i.l.bf16 %v2732_v62  ;;  %v2734_v58 = vunpack.i.h.bf16 %v2732_v62  ;;  %v2748_v44 = vunpack.i.l.bf16 %v2747_v26  ;;  %v2749_v7 = vunpack.i.h.bf16 %v2747_v26 }
  0xec   : > { %v1033_v10 = vsel %vm1020_vm6, %v1012_v55, %v2733_v36  ;;  %v1034_v20 = vsel %vm1020_vm6, %v1013_v8, %v2734_v58  ;;  %v951_v18 = vsel %vm936_vm2, %v3480_v22, %v2748_v44  ;;  %v952_v33 = vsel %vm936_vm2, %v3483_v23, %v2749_v7 }
  0xed   : > { %v2742_v60 = vpop.permute.xlu0 %2741  ;;  %v2757_v63 = vpop.permute.xlu1 %2756  ;;  %v1054_v45 = vsel %vm1041_vm7, %v1033_v10, %v2738_v12  ;;  %v1055_v38 = vsel %vm1041_vm7, %v1034_v20, %v2739_v15 }
  0xee   : > { %v2743_v9 = vunpack.i.l.bf16 %v2742_v60  ;;  %v2744_v30 = vunpack.i.h.bf16 %v2742_v60  ;;  %v2758_v2 = vunpack.i.l.bf16 %v2757_v63  ;;  %v2759_v19 = vunpack.i.h.bf16 %v2757_v63 }
  0xf0   : > { %v1075_v13 = vsel %vm1062_vm8, %v1054_v45, %v2743_v9  ;;  %v1076_v52 = vsel %vm1062_vm8, %v1055_v38, %v2744_v30 }
  0xf1   : > { %v2752_v6 = vpop.permute.xlu0 %2751  ;;  %1273 = vmatmul.mubr.f32.gmra.mrb[24].mxu0 %v1075_v13  ;;  %v2767_v21 = vpop.permute.xlu1 %2766 }
  0xf2   : > { %v2754_v24 = vunpack.i.h.bf16 %v2752_v6  ;;  %v2753_v28 = vunpack.i.l.bf16 %v2752_v6  ;;  %2344 = vmatprep.mubr.msk.f32.mxu0 %vm936_vm2, %v3552_v11  ;;  %v2768_v11 = vunpack.i.l.bf16 %v2767_v21  ;;  %v2769_v29 = vunpack.i.h.bf16 %v2767_v21 }
  0xf4   : > { %v972_v31 = vsel %vm957_vm3, %v951_v18, %v2753_v28  ;;  %v973_v3 = vsel %vm957_vm3, %v952_v33, %v2754_v24  ;;  %v931_v28 = vrot.slane %v3608_v48, 2 }
  0xf5   : > { %v2762_v22 = vpop.permute.xlu0 %2761  ;;  %1278 = vmatmul.mubr.f32.gmra.mrb[26].mxu0 %v1076_v52  ;;  %v2777_v32 = vpop.permute.xlu1 %2776  ;;  %v993_v23 = vsel %vm978_vm4, %v972_v31, %v2758_v2  ;;  %v994_v34 = vsel %vm978_vm4, %v973_v3, %v2759_v19  ;;  %v932_v52 = vrot.slane %v3612_v14, 2 }
  0xf6   : > { %v2764_v50 = vunpack.i.h.bf16 %v2762_v22  ;;  %v2763_v1 = vunpack.i.l.bf16 %v2762_v22  ;;  %2345 = vmatprep.mubr.msk.f32.mxu0 %vm936_vm2, %v3580_v40  ;;  %v2778_v51 = vunpack.i.l.bf16 %v2777_v32  ;;  %v2779_v40 = vunpack.i.h.bf16 %v2777_v32 }
  0xf7   : > { %v933_v14 = vsel %vm499_vm1, %v931_v28, %v932_v52 }
  0xf8   : > { %v1014_v27 = vsel %vm999_vm5, %v993_v23, %v2763_v1  ;;  %v1015_v54 = vsel %vm999_vm5, %v994_v34, %v2764_v50 }
  0xf9   : > { %v2772_v35 = vpop.permute.xlu0 %2771  ;;  %v2787_v16 = vpop.permute.xlu1 %2786  ;;  %v1035_v37 = vsel %vm1020_vm6, %v1014_v27, %v2768_v11  ;;  %v1036_v62 = vsel %vm1020_vm6, %v1015_v54, %v2769_v29 }
  0xfa   : > { %v2774_v57 = vunpack.i.h.bf16 %v2772_v35  ;;  %v2773_v49 = vunpack.i.l.bf16 %v2772_v35  ;;  %v2788_v39 = vunpack.i.l.bf16 %v2787_v16  ;;  %v2789_v60 = vunpack.i.h.bf16 %v2787_v16 }
  0xfc   : > { %v1056_v47 = vsel %vm1041_vm7, %v1035_v37, %v2773_v49  ;;  %v1057_v36 = vsel %vm1041_vm7, %v1036_v62, %v2774_v57 }
  0xfd   : > { %v2782_v53 = vpop.permute.xlu0 %2781  ;;  %v1077_v25 = vsel %vm1062_vm8, %v1056_v47, %v2778_v51  ;;  %v2797_v4 = vpop.permute.xlu1 %2796  ;;  %v1078_v59 = vsel %vm1062_vm8, %v1057_v36, %v2779_v40 }
  0xfe   : > { %v2783_v26 = vunpack.i.l.bf16 %v2782_v53  ;;  %1283 = vmatmul.mubr.f32.gmra.mrb[28].mxu0 %v1077_v25  ;;  %v2784_v56 = vunpack.i.h.bf16 %v2782_v53  ;;  %v2798_v63 = vunpack.i.l.bf16 %v2797_v4  ;;  %v2799_v30 = vunpack.i.h.bf16 %v2797_v4 }
  0xff   : > { %2346 = vmatprep.mubr.msk.f32.mxu0 %vm936_vm2, %v3586_v42 }
 0x100   : > { %v953_v55 = vsel %vm936_vm2, %v3513_v43, %v2783_v26  ;;  %v954_v42 = vsel %vm936_vm2, %v3516_v46, %v2784_v56 }
 0x101   : > { %v2792_v12 = vpop.permute.xlu0 %2791  ;;  %v2807_v58 = vpop.permute.xlu1 %2806  ;;  %v974_v44 = vsel %vm957_vm3, %v953_v55, %v2788_v39  ;;  %v975_v45 = vsel %vm957_vm3, %v954_v42, %v2789_v60  ;;  %v3850_v60 = vld [vmem:[%s4429_s3] ss:$0 sm:$0xff] }
 0x102   : > { %v2793_v10 = vunpack.i.l.bf16 %v2792_v12  ;;  %1288 = vmatmul.mubr.f32.gmra.mrb[30].mxu0 %v1078_v59  ;;  %v2794_v9 = vunpack.i.h.bf16 %v2792_v12  ;;  %v2808_v20 = vunpack.i.l.bf16 %v2807_v58  ;;  %v2809_v38 = vunpack.i.h.bf16 %v2807_v58 }
 0x103   : > { %2347 = vmatprep.mubr.msk.f32.mxu0 %vm936_vm2, %v3623_v61  ;;  %v3844_v58 = vstv %s2351_s8  ;;  %s310_s8 = scalar_lea.vmem %s4427_s1, %s2381_s28 }
 0x104   : > { %v995_v8 = vsel %vm978_vm4, %v974_v44, %v2793_v10  ;;  %v996_v18 = vsel %vm978_vm4, %v975_v45, %v2794_v9  ;;  %v2352_v10 = vadd.s32 4294967295, %v3844_v58  ;;  %vm1353_vm13 = vcmp.ge.s32.totalorder %v3844_v58, 0 }
 0x105   : > { %v2802_v43 = vpop.permute.xlu0 %2801  ;;  %v2817_v15 = vpop.permute.xlu1 %2816  ;;  %v1016_v13 = vsel %vm999_vm5, %v995_v8, %v2798_v63  ;;  %v1017_v2 = vsel %vm999_vm5, %v996_v18, %v2799_v30  ;;  %vm1363_vm14 = vcmp.lt.s32.totalorder %v3844_v58, 16 }
 0x106   : > { %v2803_v7 = vunpack.i.l.bf16 %v2802_v43  ;;  %v2804_v6 = vunpack.i.h.bf16 %v2802_v43  ;;  %v2818_v24 = vunpack.i.l.bf16 %v2817_v15  ;;  %v2819_v1 = vunpack.i.h.bf16 %v2817_v15  ;;  %vm3868_vm15 = vmand %vm1353_vm13, %vm1363_vm14 }
 0x107   : > { %vm1352_vm9 = vcmp.ge.s32.totalorder %v2352_v10, 0  ;;  %vm1362_vm10 = vcmp.lt.s32.totalorder %v2352_v10, 16 }
 0x108   : > { %v1037_v61 = vsel %vm1020_vm6, %v1016_v13, %v2803_v7  ;;  %v1038_v32 = vsel %vm1020_vm6, %v1017_v2, %v2804_v6  ;;  %v955_v3 = vsel %vm936_vm2, %v3540_v0, %v2818_v24  ;;  %v956_v0 = vsel %vm936_vm2, %v3543_v5, %v2819_v1  ;;  %vm1372_vm11 = vmand %vm1352_vm9, %vm1362_vm10 }
 0x109   : > { %v2812_v21 = vpop.permute.xlu0 %2811  ;;  %v2827_v46 = vpop.permute.xlu1 %2826  ;;  %v1058_v31 = vsel %vm1041_vm7, %v1037_v61, %v2808_v20  ;;  %v1059_v27 = vsel %vm1041_vm7, %v1038_v32, %v2809_v38 }
 0x10a   : > { %v2813_v33 = vunpack.i.l.bf16 %v2812_v21  ;;  %v2814_v19 = vunpack.i.h.bf16 %v2812_v21  ;;  %v2828_v11 = vunpack.i.l.bf16 %v2827_v46  ;;  %v2829_v57 = vunpack.i.h.bf16 %v2827_v46 }
 0x10c   : > { %v1079_v22 = vsel %vm1062_vm8, %v1058_v31, %v2813_v33  ;;  %v1080_v29 = vsel %vm1062_vm8, %v1059_v27, %v2814_v19 }
 0x10d   : > { %v2822_v50 = vpop.permute.xlu0 %2821  ;;  %1293 = vmatmul.mubr.f32.gmra.mrb[32].mxu0 %v1079_v22  ;;  %v780_v23 = vpop.permute.xlu1 %779 }
 0x10e   : > { %v2823_v48 = vunpack.i.l.bf16 %v2822_v50  ;;  %2348 = vmatprep.mubr.msk.f32.mxu0 %vm936_vm2, %v3663_v41  ;;  %v2824_v35 = vunpack.i.h.bf16 %v2822_v50  ;;  %v934_v41 = vrot.slane %v3649_v17, 2 }
 0x110   : > { %v976_v34 = vsel %vm957_vm3, %v955_v3, %v2823_v48  ;;  %v977_v47 = vsel %vm957_vm3, %v956_v0, %v2824_v35  ;;  %v935_v4 = vsel %vm499_vm1, %v932_v52, %v934_v41  ;;  %v1335_v35 = vadd.s32 2, %v3844_v58 }
 0x111   : > { %v2832_v51 = vpop.permute.xlu0 %2831  ;;  %1298 = vmatmul.mubr.f32.gmra.mrb[34].mxu0 %v1080_v29  ;;  %v997_v54 = vsel %vm978_vm4, %v976_v34, %v2828_v11  ;;  %v908_v37 = vpop.permute.xlu1 %907  ;;  %v998_v17 = vsel %vm978_vm4, %v977_v47, %v2829_v57 }
 0x112   : > { %v2833_v16 = vunpack.i.l.bf16 %v2832_v51  ;;  %2349 = vmatprep.mubr.msk.f32.mxu0 %vm936_vm2, %v933_v14  ;;  %v2834_v40 = vunpack.i.h.bf16 %v2832_v51 }
 0x114   : > { %v1018_v49 = vsel %vm999_vm5, %v997_v54, %v2833_v16  ;;  %v1019_v36 = vsel %vm999_vm5, %v998_v17, %v2834_v40  ;;  %v2353_v54 = vadd.s32 4294967295, %v1335_v35 }
 0x115   : > { %v1039_v53 = vsel %vm1020_vm6, %v1018_v49, %v780_v23  ;;  %v842_v25 = vpop.permute.xlu0 %841  ;;  %v844_v56 = vpop.permute.xlu1 %843 }
 0x116   : > { %v1060_v5 = vsel %vm1041_vm7, %v1039_v53, %v842_v25  ;;  %vm1354_vm9 = vcmp.ge.s32.totalorder %v2353_v54, 0  ;;  %vm1364_vm10 = vcmp.lt.s32.totalorder %v2353_v54, 16 }
 0x117   : > { %v1081_v62 = vsel %vm1062_vm8, %v1060_v5, %v908_v37 }
 0x118   : > { %1303 = vmatmul.mubr.f32.gmra.mrb[36].mxu0 %v1081_v62 }
 0x119   : > { %v782_v26 = vpop.permute.xlu0 %781  ;;  %2350 = vmatprep.mubr.msk.f32.mxu0 %vm936_vm2, %v935_v4 }
 0x11a   : > { %v1040_v39 = vsel %vm1020_vm6, %v1019_v36, %v782_v26 }
 0x11b   : > { %v1061_v55 = vsel %vm1041_vm7, %v1040_v39, %v844_v56 }
 0x11d   : > { %v910_v12 = vpop.permute.xlu0 %909 }
 0x11e   : > { %v1082_v59 = vsel %vm1062_vm8, %v1061_v55, %v910_v12 }
 0x11f   : > { %1308 = vmatmul.mubr.f32.gmra.mrb[38].mxu0 %v1082_v59 }
 0x170   : > { %v1214_v44 = vpop.f32.mrb[0].mxu0 }
 0x171   : > { %v1215_v63 = vadd.f32 %v3850_v60, %v1214_v44  ;;  %v1216_v42 = vpop.f32.mrb[1].mxu0 }
 0x173   : > { %v1313_v9 = vmax.f32 %v1215_v63, 0.0  ;;  %v1336_v63 = vadd.s32 3, %v3844_v58 }
 0x174   : > { %v1219_v8 = vpop.f32.mrb[2].mxu0 }
 0x175   : > { %v1402_v43 = vsel %vm1372_vm11, %v1313_v9, 0.0  ;;  %v1220_v15 = vadd.f32 %v3850_v60, %v1219_v8  ;;  %v1221_v7 = vpop.f32.mrb[3].mxu0 }
 0x176   : > { %v1443_v45 = vrot.slane %v1402_v43, 7 }
 0x177   : > { %v1314_v30 = vmax.f32 %v1220_v15, 0.0 }
 0x178   : > { %v3855_v13 = vsel %vm1442_vm12, 0.0, %v1443_v45 }
 0x179   : > { %v1403_v20 = vsel %vm1372_vm11, %v1314_v30, 0.0  ;;  %v1537_v6 = vrot.slane %v3855_v13, 1  ;;  %v1625_v61 = vrot.slane %v3855_v13, 2  ;;  %vm3903_vm11 = vmand %vm1354_vm9, %vm1364_vm10 }
 0x17a   : > { %v1444_v18 = vrot.slane %v1403_v20, 7  ;;  %vm3940_vm9 = vmpackc.low %vm936_vm2, %vm936_vm2 }
 0x17c   : > { %v3862_v21 = vsel %vm1442_vm12, %v1443_v45, %v1444_v18  ;;  %v1511_v24 = vsel %vm1442_vm12, %v1444_v18, 0.0  ;;  %v2354_v45 = vadd.s32 4294967295, %v1336_v63 }
 0x17d   : > { %v1540_v46 = vrot.slane %v1511_v24, 1  ;;  %v1628_v28 = vrot.slane %v1511_v24, 2  ;;  %v1224_v33 = vpop.f32.mrb[4].mxu0  ;;  %v1626_v2 = vrot.slane %v3862_v21, 2  ;;  %v1538_v38 = vrot.slane %v3862_v21, 1 }
 0x17e   : > { %v1225_v31 = vadd.f32 %v3850_v60, %v1224_v33  ;;  %v1226_v52 = vpop.f32.mrb[5].mxu0  ;;  %vm1355_vm13 = vcmp.ge.s32.totalorder %v2354_v45, 0  ;;  %vm1365_vm14 = vcmp.lt.s32.totalorder %v2354_v45, 16 }
 0x17f   : > { %v1627_v22 = vsel %vm499_vm1, %v1625_v61, %v1626_v2  ;;  %v1629_v32 = vsel %vm499_vm1, %v1626_v2, %v1628_v28  ;;  %v1539_v3 = vsel %vm388_vm0, %v1537_v6, %v1538_v38  ;;  %v1541_v50 = vsel %vm388_vm0, %v1538_v38, %v1540_v46 }
 0x180   : > { %v1315_v1 = vmax.f32 %v1225_v31, 0.0  ;;  %v2840_v48 = vpack.i.bf16 %v1629_v32, %v1627_v22  ;;  %v2835_v23 = vpack.i.bf16 %v1541_v50, %v1539_v3 }
 0x181   : > { %v1229_v11 = vpop.f32.mrb[6].mxu0 }
 0x182   : > { %v1404_v27 = vsel %vm3868_vm15, %v1315_v1, 0.0  ;;  %v1230_v14 = vadd.f32 %v3850_v60, %v1229_v11  ;;  %v1231_v34 = vpop.f32.mrb[7].mxu0  ;;  %2841 = vrot.lane.b32.xlu0 %v2840_v48, %s3161_s20  ;;  %2836 = vrot.lane.b32.xlu1 %v2835_v23, %s3159_s14 }
 0x183   : > { %v1446_v29 = vrot.slane %v1404_v27, 7 }
 0x184   : > { %v1316_v51 = vmax.f32 %v1230_v14, 0.0 }
 0x185   : > { %v3883_v0 = vsel %vm1442_vm12, 0.0, %v1446_v29 }
 0x186   : > { %v1405_v16 = vsel %vm3868_vm15, %v1316_v51, 0.0  ;;  %v1542_v57 = vrot.slane %v3883_v0, 1  ;;  %v1630_v5 = vrot.slane %v3883_v0, 2  ;;  %vm3929_vm15 = vmand %vm1355_vm13, %vm1365_vm14 }
 0x187   : > { %v1447_v41 = vrot.slane %v1405_v16, 7 }
 0x189   : > { %v3889_v49 = vsel %vm1442_vm12, %v1446_v29, %v1447_v41  ;;  %v1512_v37 = vsel %vm1442_vm12, %v1447_v41, 0.0  ;;  %v1337_v41 = vadd.s32 4, %v3844_v58 }
 0x18a   : > { %v1545_v47 = vrot.slane %v1512_v37, 1  ;;  %v1633_v40 = vrot.slane %v1512_v37, 2  ;;  %v2845_v53 = vpack.i.bf16 %v3889_v49, %v3883_v0  ;;  %v1543_v25 = vrot.slane %v3889_v49, 1 }
 0x18b   : > { %v1631_v4 = vrot.slane %v3889_v49, 2 }
 0x18c   : > { %v1234_v62 = vpop.f32.mrb[8].mxu0  ;;  %2846 = vrot.lane.b32.xlu1 %v2845_v53, %s3158_s11  ;;  %v1544_v17 = vsel %vm388_vm0, %v1542_v57, %v1543_v25  ;;  %v1546_v26 = vsel %vm388_vm0, %v1543_v25, %v1545_v47  ;;  %v2355_v53 = vadd.s32 4294967295, %v1337_v41 }
 0x18d   : > { %v1235_v36 = vadd.f32 %v3850_v60, %v1234_v62  ;;  %v1236_v39 = vpop.f32.mrb[9].mxu0  ;;  %v2850_v56 = vpack.i.bf16 %v1546_v26, %v1544_v17  ;;  %v1632_v55 = vsel %vm499_vm1, %v1630_v5, %v1631_v4  ;;  %v1634_v12 = vsel %vm499_vm1, %v1631_v4, %v1633_v40 }
 0x18e   : > { %v2855_v10 = vpack.i.bf16 %v1634_v12, %v1632_v55  ;;  %vm1356_vm10 = vcmp.ge.s32.totalorder %v2355_v53, 0 }
 0x18f   : > { %v1317_v44 = vmax.f32 %v1235_v36, 0.0  ;;  %2851 = vrot.lane.b32.xlu0 %v2850_v56, %s3162_s22 }
 0x190   : > { %v1239_v42 = vpop.f32.mrb[10].mxu0  ;;  %2856 = vrot.lane.b32.xlu1 %v2855_v10, %s3163_s10 }
 0x191   : > { %v1406_v9 = vsel %vm3903_vm11, %v1317_v44, 0.0  ;;  %v1240_v8 = vadd.f32 %v3850_v60, %v1239_v42  ;;  %v1241_v43 = vpop.f32.mrb[11].mxu0 }
 0x192   : > { %v1449_v15 = vrot.slane %v1406_v9, 7 }
 0x193   : > { %v1318_v7 = vmax.f32 %v1240_v8, 0.0  ;;  %2861 = vrot.lane.b32.xlu0 %v2850_v56, %s3159_s14 }
 0x194   : > { %2866 = vrot.lane.b32.xlu1 %v2855_v10, %s3161_s20  ;;  %v3916_v30 = vsel %vm1442_vm12, 0.0, %v1449_v15 }
 0x195   : > { %v1407_v20 = vsel %vm3903_vm11, %v1318_v7, 0.0  ;;  %v1635_v24 = vrot.slane %v3916_v30, 2  ;;  %v1547_v22 = vrot.slane %v3916_v30, 1  ;;  %vm1366_vm11 = vcmp.lt.s32.totalorder %v2355_v53, 16 }
 0x196   : > { %v1450_v18 = vrot.slane %v1407_v20, 7  ;;  %vm3979_vm13 = vmand %vm1356_vm10, %vm1366_vm11 }
 0x198   : > { %v3921_v6 = vsel %vm1442_vm12, %v1449_v15, %v1450_v18  ;;  %v1513_v61 = vsel %vm1442_vm12, %v1450_v18, 0.0  ;;  %v1338_v15 = vadd.s32 5, %v3844_v58 }
 0x199   : > { %v1550_v46 = vrot.slane %v1513_v61, 1  ;;  %v1638_v28 = vrot.slane %v1513_v61, 2  ;;  %v1244_v33 = vpop.f32.mrb[12].mxu0  ;;  %v2870_v2 = vpack.i.bf16 %v3921_v6, %v3916_v30  ;;  %v1636_v38 = vrot.slane %v3921_v6, 2 }
 0x19a   : > { %v1245_v31 = vadd.f32 %v3850_v60, %v1244_v33  ;;  %v1246_v19 = vpop.f32.mrb[13].mxu0  ;;  %v1548_v32 = vrot.slane %v3921_v6, 1 }
 0x19b   : > { %2871 = vrot.lane.b32.xlu0 %v2870_v2, %s3160_s15  ;;  %v1637_v3 = vsel %vm499_vm1, %v1635_v24, %v1636_v38  ;;  %v1639_v50 = vsel %vm499_vm1, %v1636_v38, %v1638_v28  ;;  %v2356_v28 = vadd.s32 4294967295, %v1338_v15 }
 0x19c   : > { %v1319_v48 = vmax.f32 %v1245_v31, 0.0  ;;  %v2410_v23 = vpack.c.bf16 %v1639_v50, %v1637_v3  ;;  %v1549_v11 = vsel %vm388_vm0, %v1547_v22, %v1548_v32  ;;  %v1551_v27 = vsel %vm388_vm0, %v1548_v32, %v1550_v46 }
 0x19d   : > { %v1249_v14 = vpop.f32.mrb[14].mxu0  ;;  %v2880_v34 = vpack.i.bf16 %v1551_v27, %v1549_v11  ;;  %v2890_v57 = vpack.i.bf16 %v1639_v50, %v1637_v3  ;;  %vm1357_vm14 = vcmp.ge.s32.totalorder %v2356_v28, 0 }
 0x19e   : > { %v1408_v29 = vsel %vm3929_vm15, %v1319_v48, 0.0  ;;  %v1250_v35 = vadd.f32 %v3850_v60, %v1249_v14  ;;  %v1251_v51 = vpop.f32.mrb[15].mxu0  ;;  %2412 = vmatprep.subr.msk.bf16.mxu1 %vm3940_vm9, %v2410_v23 }
 0x19f   : > { %v1452_v16 = vrot.slane %v1408_v29, 7  ;;  %2881 = vrot.lane.b32.xlu1 %v2880_v34, %s3164_s18  ;;  %2876 = vrot.lane.b32.xlu0 %v2870_v2, %s3158_s11 }
 0x1a0   : > { %v1320_v54 = vmax.f32 %v1250_v35, 0.0 }
 0x1a1   : > { %v3957_v47 = vsel %vm1442_vm12, 0.0, %v1452_v16 }
 0x1a2   : > { %v1409_v37 = vsel %vm3929_vm15, %v1320_v54, 0.0  ;;  %v1552_v17 = vrot.slane %v3957_v47, 1  ;;  %v1640_v36 = vrot.slane %v3957_v47, 2  ;;  %vm1367_vm15 = vcmp.lt.s32.totalorder %v2356_v28, 16 }
 0x1a3   : > { %v1453_v40 = vrot.slane %v1409_v37, 7  ;;  %2886 = vrot.lane.b32.xlu1 %v2880_v34, %s3162_s22  ;;  %2891 = vrot.lane.b32.xlu0 %v2890_v57, %s3163_s10  ;;  %vm4016_vm10 = vmand %vm1357_vm14, %vm1367_vm15 }
 0x1a5   : > { %v3962_v25 = vsel %vm1442_vm12, %v1452_v16, %v1453_v40  ;;  %v1514_v5 = vsel %vm1442_vm12, %v1453_v40, 0.0 }
 0x1a6   : > { %v1555_v4 = vrot.slane %v1514_v5, 1  ;;  %v1643_v62 = vrot.slane %v1514_v5, 2  ;;  %v1553_v26 = vrot.slane %v3962_v25, 1  ;;  %v1641_v39 = vrot.slane %v3962_v25, 2 }
 0x1a7   : > { %2896 = vrot.lane.b32.xlu1 %v2880_v34, %s3159_s14  ;;  %2901 = vrot.lane.b32.xlu0 %v2890_v57, %s3161_s20  ;;  %v2905_v44 = vpack.i.bf16 %v3962_v25, %v3957_v47 }
 0x1a8   : > { %v1254_v56 = vpop.f32.mrb[16].mxu0  ;;  %v1554_v55 = vsel %vm388_vm0, %v1552_v17, %v1553_v26  ;;  %v1556_v12 = vsel %vm388_vm0, %v1553_v26, %v1555_v4  ;;  %v3977_v42 = vsel %vm499_vm1, %v1640_v36, %v1641_v39  ;;  %v3984_v8 = vsel %vm499_vm1, %v1641_v39, %v1643_v62 }
 0x1a9   : > { %v1255_v59 = vadd.f32 %v3850_v60, %v1254_v56  ;;  %v1256_v10 = vpop.f32.mrb[17].mxu0  ;;  %v2915_v63 = vpack.i.bf16 %v1556_v12, %v1554_v55  ;;  %v2415_v7 = vpack.c.bf16 %v3984_v8, %v3977_v42  ;;  %v2925_v38 = vpack.i.bf16 %v3984_v8, %v3977_v42 }
 0x1aa   : > { %v1339_v17 = vadd.s32 6, %v3844_v58 }
 0x1ab   : > { %v1321_v43 = vmax.f32 %v1255_v59, 0.0  ;;  %2906 = vrot.lane.b32.xlu1 %v2905_v44, %s3160_s15  ;;  %2916 = vrot.lane.b32.xlu0 %v2915_v63, %s3164_s18 }
 0x1ac   : > { %v1259_v45 = vpop.f32.mrb[18].mxu0  ;;  %v2357_v12 = vadd.s32 4294967295, %v1339_v17 }
 0x1ad   : > { %v1410_v20 = vsel %vm3979_vm13, %v1321_v43, 0.0  ;;  %v1260_v18 = vadd.f32 %v3850_v60, %v1259_v45  ;;  %v1261_v61 = vpop.f32.mrb[19].mxu0 }
 0x1ae   : > { %v1455_v24 = vrot.slane %v1410_v20, 7  ;;  %vm1358_vm11 = vcmp.ge.s32.totalorder %v2357_v12, 0 }
 0x1af   : > { %v1322_v46 = vmax.f32 %v1260_v18, 0.0  ;;  %2911 = vrot.lane.b32.xlu1 %v2905_v44, %s3158_s11  ;;  %2921 = vrot.lane.b32.xlu0 %v2915_v63, %s3162_s22 }
 0x1b0   : > { %v3997_v33 = vsel %vm1442_vm12, 0.0, %v1455_v24 }
 0x1b1   : > { %v1411_v2 = vsel %vm3979_vm13, %v1322_v46, 0.0  ;;  %v1645_v52 = vrot.slane %v3997_v33, 2  ;;  %v1557_v14 = vrot.slane %v3997_v33, 1  ;;  %vm1368_vm13 = vcmp.lt.s32.totalorder %v2357_v12, 16 }
 0x1b2   : > { %v1456_v31 = vrot.slane %v1411_v2, 7  ;;  %vm4068_vm14 = vmand %vm1358_vm11, %vm1368_vm13 }
 0x1b3   : > { %2926 = vrot.lane.b32.xlu1 %v2925_v38, %s3163_s10  ;;  %2931 = vrot.lane.b32.xlu0 %v2915_v63, %s3159_s14 }
 0x1b4   : > { %v4007_v19 = vsel %vm1442_vm12, %v1455_v24, %v1456_v31  ;;  %v1515_v22 = vsel %vm1442_vm12, %v1456_v31, 0.0 }
 0x1b5   : > { %v1560_v32 = vrot.slane %v1515_v22, 1  ;;  %v1646_v3 = vrot.slane %v4007_v19, 2  ;;  %v1648_v50 = vrot.slane %v1515_v22, 2  ;;  %v1264_v48 = vpop.f32.mrb[20].mxu0  ;;  %v2940_v23 = vpack.i.bf16 %v4007_v19, %v3997_v33 }
 0x1b6   : > { %v1265_v11 = vadd.f32 %v3850_v60, %v1264_v48  ;;  %v1266_v27 = vpop.f32.mrb[21].mxu0  ;;  %v1558_v34 = vrot.slane %v4007_v19, 1 }
 0x1b7   : > { %2936 = vrot.lane.b32.xlu1 %v2925_v38, %s3161_s20  ;;  %2941 = vrot.lane.b32.xlu0 %v2940_v23, %s3160_s15  ;;  %v4023_v35 = vsel %vm499_vm1, %v1645_v52, %v1646_v3  ;;  %v4026_v51 = vsel %vm499_vm1, %v1646_v3, %v1648_v50  ;;  %v1340_v3 = vadd.s32 7, %v3844_v58 }
 0x1b8   : > { %v1323_v16 = vmax.f32 %v1265_v11, 0.0  ;;  %v1559_v41 = vsel %vm388_vm0, %v1557_v14, %v1558_v34  ;;  %v1561_v54 = vsel %vm388_vm0, %v1558_v34, %v1560_v32  ;;  %v2420_v4 = vpack.c.bf16 %v4026_v51, %v4023_v35 }
 0x1b9   : > { %v1269_v57 = vpop.f32.mrb[22].mxu0  ;;  %v2950_v37 = vpack.i.bf16 %v1561_v54, %v1559_v41  ;;  %v2960_v36 = vpack.i.bf16 %v4026_v51, %v4023_v35  ;;  %v2358_v34 = vadd.s32 4294967295, %v1340_v3 }
 0x1ba   : > { %v1412_v40 = vsel %vm4016_vm10, %v1323_v16, 0.0  ;;  %v1270_v53 = vadd.f32 %v3850_v60, %v1269_v57  ;;  %v1271_v5 = vpop.f32.mrb[23].mxu0 }
 0x1bb   : > { %v1458_v62 = vrot.slane %v1412_v40, 7  ;;  %2951 = vrot.lane.b32.xlu1 %v2950_v37, %s3164_s18  ;;  %2946 = vrot.lane.b32.xlu0 %v2940_v23, %s3158_s11  ;;  %vm1359_vm15 = vcmp.ge.s32.totalorder %v2358_v34, 0 }
 0x1bc   : > { %v1324_v26 = vmax.f32 %v1270_v53, 0.0 }
 0x1bd   : > { %v4041_v39 = vsel %vm1442_vm12, 0.0, %v1458_v62 }
 0x1be   : > { %v1413_v56 = vsel %vm4016_vm10, %v1324_v26, 0.0  ;;  %v1562_v59 = vrot.slane %v4041_v39, 1  ;;  %v1650_v10 = vrot.slane %v4041_v39, 2  ;;  %vm1369_vm10 = vcmp.lt.s32.totalorder %v2358_v34, 16 }
 0x1bf   : > { %v1459_v55 = vrot.slane %v1413_v56, 7  ;;  %2956 = vrot.lane.b32.xlu1 %v2950_v37, %s3162_s22  ;;  %2961 = vrot.lane.b32.xlu0 %v2960_v36, %s3163_s10  ;;  %vm4102_vm11 = vmand %vm1359_vm15, %vm1369_vm10 }
 0x1c1   : > { %v4050_v44 = vsel %vm1442_vm12, %v1458_v62, %v1459_v55  ;;  %v1516_v63 = vsel %vm1442_vm12, %v1459_v55, 0.0 }
 0x1c2   : > { %v1563_v9 = vrot.slane %v4050_v44, 1  ;;  %v1565_v43 = vrot.slane %v1516_v63, 1  ;;  %v1651_v15 = vrot.slane %v4050_v44, 2  ;;  %v1653_v45 = vrot.slane %v1516_v63, 2 }
 0x1c3   : > { %2966 = vrot.lane.b32.xlu1 %v2950_v37, %s3159_s14  ;;  %2971 = vrot.lane.b32.xlu0 %v2960_v36, %s3161_s20  ;;  %v2975_v38 = vpack.i.bf16 %v4050_v44, %v4041_v39 }
 0x1c4   : > { %v1274_v20 = vpop.f32.mrb[24].mxu0  ;;  %v1564_v18 = vsel %vm388_vm0, %v1562_v59, %v1563_v9  ;;  %v1566_v61 = vsel %vm388_vm0, %v1563_v9, %v1565_v43  ;;  %v4060_v24 = vsel %vm499_vm1, %v1650_v10, %v1651_v15  ;;  %v4063_v46 = vsel %vm499_vm1, %v1651_v15, %v1653_v45 }
 0x1c5   : > { %v1275_v28 = vadd.f32 %v3850_v60, %v1274_v20  ;;  %v1276_v2 = vpop.f32.mrb[25].mxu0  ;;  %v2985_v31 = vpack.i.bf16 %v1566_v61, %v1564_v18  ;;  %v2425_v22 = vpack.c.bf16 %v4063_v46, %v4060_v24  ;;  %v2995_v41 = vpack.i.bf16 %v4063_v46, %v4060_v24 }
 0x1c6   : > { %v1342_v59 = vadd.s32 9, %v3844_v58 }
 0x1c7   : > { %v1325_v32 = vmax.f32 %v1275_v28, 0.0  ;;  %2976 = vrot.lane.b32.xlu1 %v2975_v38, %s3160_s15  ;;  %2986 = vrot.lane.b32.xlu0 %v2985_v31, %s3164_s18 }
 0x1c8   : > { %v1279_v50 = vpop.f32.mrb[26].mxu0 }
 0x1c9   : > { %v1414_v48 = vsel %vm4068_vm14, %v1325_v32, 0.0  ;;  %v1280_v23 = vadd.f32 %v3850_v60, %v1279_v50  ;;  %v1281_v11 = vpop.f32.mrb[27].mxu0 }
 0x1ca   : > { %v1461_v27 = vrot.slane %v1414_v48, 7 }
 0x1cb   : > { %v1326_v14 = vmax.f32 %v1280_v23, 0.0  ;;  %2981 = vrot.lane.b32.xlu1 %v2975_v38, %s3158_s11  ;;  %2991 = vrot.lane.b32.xlu0 %v2985_v31, %s3162_s22 }
 0x1cc   : > { %v4083_v29 = vsel %vm1442_vm12, 0.0, %v1461_v27 }
 0x1cd   : > { %v1415_v16 = vsel %vm4068_vm14, %v1326_v14, 0.0  ;;  %v1567_v57 = vrot.slane %v4083_v29, 1  ;;  %v1655_v37 = vrot.slane %v4083_v29, 2 }
 0x1ce   : > { %v1462_v54 = vrot.slane %v1415_v16, 7 }
 0x1cf   : > { %2996 = vrot.lane.b32.xlu1 %v2995_v41, %s3163_s10  ;;  %3001 = vrot.lane.b32.xlu0 %v2985_v31, %s3159_s14  ;;  %v1341_v31 = vadd.s32 8, %v3844_v58 }
 0x1d0   : > { %v4094_v40 = vsel %vm1442_vm12, %v1461_v27, %v1462_v54  ;;  %v1517_v53 = vsel %vm1442_vm12, %v1462_v54, 0.0 }
 0x1d1   : > { %v1568_v5 = vrot.slane %v4094_v40, 1  ;;  %v1570_v62 = vrot.slane %v1517_v53, 1  ;;  %v1656_v17 = vrot.slane %v4094_v40, 2  ;;  %v1658_v26 = vrot.slane %v1517_v53, 2  ;;  %v1284_v36 = vpop.f32.mrb[28].mxu0 }
 0x1d2   : > { %v1285_v56 = vadd.f32 %v3850_v60, %v1284_v36  ;;  %v1286_v55 = vpop.f32.mrb[29].mxu0  ;;  %v3010_v12 = vpack.i.bf16 %v4094_v40, %v4083_v29  ;;  %v2359_v23 = vadd.s32 4294967295, %v1341_v31 }
 0x1d3   : > { %3006 = vrot.lane.b32.xlu1 %v2995_v41, %s3161_s20  ;;  %v1569_v10 = vsel %vm388_vm0, %v1567_v57, %v1568_v5  ;;  %v1571_v63 = vsel %vm388_vm0, %v1568_v5, %v1570_v62  ;;  %v4110_v9 = vsel %vm499_vm1, %v1655_v37, %v1656_v17  ;;  %v4113_v43 = vsel %vm499_vm1, %v1656_v17, %v1658_v26 }
 0x1d4   : > { %v1327_v15 = vmax.f32 %v1285_v56, 0.0  ;;  %3011 = vrot.lane.b32.xlu0 %v3010_v12, %s3160_s15  ;;  %v3020_v45 = vpack.i.bf16 %v1571_v63, %v1569_v10  ;;  %v2430_v18 = vpack.c.bf16 %v4113_v43, %v4110_v9  ;;  %v3030_v50 = vpack.i.bf16 %v4113_v43, %v4110_v9 }
 0x1d5   : > { %v1289_v20 = vpop.f32.mrb[30].mxu0  ;;  %vm1360_vm13 = vcmp.ge.s32.totalorder %v2359_v23, 0  ;;  %vm1370_vm14 = vcmp.lt.s32.totalorder %v2359_v23, 16 }
 0x1d6   : > { %v1416_v61 = vsel %vm4102_vm11, %v1327_v15, 0.0  ;;  %v1290_v28 = vadd.f32 %v3850_v60, %v1289_v20  ;;  %v1291_v2 = vpop.f32.mrb[31].mxu0  ;;  %vm4154_vm15 = vmand %vm1360_vm13, %vm1370_vm14 }
 0x1d7   : > { %v1464_v38 = vrot.slane %v1416_v61, 7  ;;  %3021 = vrot.lane.b32.xlu1 %v3020_v45, %s3164_s18  ;;  %v2360_v2 = vadd.s32 4294967295, %v1342_v59 }
 0x1d8   : > { %v1328_v52 = vmax.f32 %v1290_v28, 0.0  ;;  %3016 = vrot.lane.b32.xlu0 %v3010_v12, %s3158_s11 }
 0x1d9   : > { %v4125_v32 = vsel %vm1442_vm12, 0.0, %v1464_v38  ;;  %vm1361_vm10 = vcmp.ge.s32.totalorder %v2360_v2, 0 }
 0x1da   : > { %v1417_v3 = vsel %vm4102_vm11, %v1328_v52, 0.0  ;;  %v1572_v11 = vrot.slane %v4125_v32, 1  ;;  %v1660_v27 = vrot.slane %v4125_v32, 2  ;;  %vm1371_vm11 = vcmp.lt.s32.totalorder %v2360_v2, 16 }
 0x1db   : > { %v1465_v48 = vrot.slane %v1417_v3, 7  ;;  %3026 = vrot.lane.b32.xlu1 %v3020_v45, %s3162_s22  ;;  %vm4179_vm13 = vmand %vm1361_vm10, %vm1371_vm11 }
 0x1dc   : > { %3031 = vrot.lane.b32.xlu0 %v3030_v50, %s3163_s10 }
 0x1dd   : > { %v4136_v14 = vsel %vm1442_vm12, %v1464_v38, %v1465_v48  ;;  %v1518_v34 = vsel %vm1442_vm12, %v1465_v48, 0.0 }
 0x1de   : > { %v1573_v16 = vrot.slane %v4136_v14, 1  ;;  %v1575_v41 = vrot.slane %v1518_v34, 1  ;;  %v1661_v54 = vrot.slane %v4136_v14, 2  ;;  %v1663_v57 = vrot.slane %v1518_v34, 2 }
 0x1df   : > { %3036 = vrot.lane.b32.xlu1 %v3020_v45, %s3159_s14  ;;  %v3045_v56 = vpack.i.bf16 %v4136_v14, %v4125_v32 }
 0x1e0   : > { %3041 = vrot.lane.b32.xlu0 %v3030_v50, %s3161_s20  ;;  %v1294_v37 = vpop.f32.mrb[32].mxu0  ;;  %v1574_v53 = vsel %vm388_vm0, %v1572_v11, %v1573_v16  ;;  %v1576_v5 = vsel %vm388_vm0, %v1573_v16, %v1575_v41  ;;  %v4146_v62 = vsel %vm499_vm1, %v1660_v27, %v1661_v54  ;;  %v4149_v17 = vsel %vm499_vm1, %v1661_v54, %v1663_v57 }
 0x1e1   : > { %v1295_v26 = vadd.f32 %v3850_v60, %v1294_v37  ;;  %v1296_v36 = vpop.f32.mrb[33].mxu0  ;;  %v3055_v55 = vpack.i.bf16 %v1576_v5, %v1574_v53  ;;  %v2435_v10 = vpack.c.bf16 %v4149_v17, %v4146_v62  ;;  %v3065_v52 = vpack.i.bf16 %v4149_v17, %v4146_v62 }
 0x1e3   : > { %v1329_v63 = vmax.f32 %v1295_v26, 0.0  ;;  %3046 = vrot.lane.b32.xlu1 %v3045_v56, %s3160_s15 }
 0x1e4   : > { %3056 = vrot.lane.b32.xlu0 %v3055_v55, %s3164_s18  ;;  %v1299_v15 = vpop.f32.mrb[34].mxu0 }
 0x1e5   : > { %v1418_v45 = vsel %vm4154_vm15, %v1329_v63, 0.0  ;;  %v1300_v20 = vadd.f32 %v3850_v60, %v1299_v15  ;;  %v1301_v61 = vpop.f32.mrb[35].mxu0 }
 0x1e6   : > { %v1467_v28 = vrot.slane %v1418_v45, 7 }
 0x1e7   : > { %v1330_v38 = vmax.f32 %v1300_v20, 0.0  ;;  %3051 = vrot.lane.b32.xlu1 %v3045_v56, %s3158_s11 }
 0x1e8   : > { %v1509_v58 = vsel %vm1442_vm12, 0.0, %v1467_v28  ;;  %3061 = vrot.lane.b32.xlu0 %v3055_v55, %s3162_s22 }
 0x1e9   : > { %v1419_v31 = vsel %vm4154_vm15, %v1330_v38, 0.0  ;;  %v1763_v50 = vrot.slane %v1509_v58, 1  ;;  %v1816_v23 = vrot.slane %v1509_v58, 2 }
 0x1ea   : > { %v1468_v3 = vrot.slane %v1419_v31, 7 }
 0x1eb   : > { %3066 = vrot.lane.b32.xlu1 %v3065_v52, %s3163_s10  ;;  %v1304_v48 = vpop.f32.mrb[36].mxu0 }
 0x1ec   : > { %v1469_v11 = vsel %vm1442_vm12, %v1467_v28, %v1468_v3  ;;  %v1519_v27 = vsel %vm1442_vm12, %v1468_v3, 0.0  ;;  %v1305_v34 = vadd.f32 %v3850_v60, %v1304_v48  ;;  %3071 = vrot.lane.b32.xlu0 %v3055_v55, %s3159_s14  ;;  %v1306_v16 = vpop.f32.mrb[37].mxu0 }
 0x1ed   : > { %v1764_v41 = vrot.slane %v1469_v11, 1  ;;  %v1766_v54 = vrot.slane %v1519_v27, 1  ;;  %v1817_v57 = vrot.slane %v1469_v11, 2  ;;  %v1819_v37 = vrot.slane %v1519_v27, 2 }
 0x1ee   : > { %v1331_v5 = vmax.f32 %v1305_v34, 0.0  ;;  %v3080_v26 = vpack.i.bf16 %v1469_v11, %v1509_v58 }
 0x1ef   : > { %3076 = vrot.lane.b32.xlu1 %v3065_v52, %s3161_s20  ;;  %v1765_v36 = vsel %vm388_vm0, %v1763_v50, %v1764_v41  ;;  %v1767_v56 = vsel %vm388_vm0, %v1764_v41, %v1766_v54  ;;  %v4187_v55 = vsel %vm499_vm1, %v1816_v23, %v1817_v57  ;;  %v4190_v12 = vsel %vm499_vm1, %v1817_v57, %v1819_v37 }
 0x1f0   : > { %v1420_v59 = vsel %vm4179_vm13, %v1331_v5, 0.0  ;;  %3081 = vrot.lane.b32.xlu0 %v3080_v26, %s3160_s15  ;;  %v3090_v63 = vpack.i.bf16 %v1767_v56, %v1765_v36  ;;  %v3100_v15 = vpack.i.bf16 %v4190_v12, %v4187_v55  ;;  %v2440_v45 = vpack.c.bf16 %v4190_v12, %v4187_v55 }
 0x1f1   : > { %v1470_v61 = vrot.slane %v1420_v59, 7 }
 0x1f2   : > { %v1309_v20 = vpop.f32.mrb[38].mxu0 }
 0x1f3   : > { %v1310_v28 = vadd.f32 %v3850_v60, %v1309_v20  ;;  %3091 = vrot.lane.b32.xlu1 %v3090_v63, %s3164_s18  ;;  %v1311_v2 = vpop.f32.mrb[39].mxu0  ;;  %v1510_v58 = vsel %vm1442_vm12, 0.0, %v1470_v61  ;;  %v2090_v60 = vld [vmem:[%s4430_s4 + $0x8] sm:$0xff] }
 0x1f4   : > { %3086 = vrot.lane.b32.xlu0 %v3080_v26, %s3158_s11  ;;  %2377 = vmatprep.mubr.msk.f32.mxu1 %vm936_vm2, %v2090_v60  ;;  %v1919_v3 = vrot.slane %v1510_v58, 1  ;;  %v1972_v50 = vrot.slane %v1510_v58, 2  ;;  %v2837_v54 = vpop.permute.xlu1 %2836  ;;  %v2842_v56 = vpop.permute.xlu0 %2841  ;;  %v2211_v20 = vld [vmem:[%s4431_s5 + $0x8] sm:$0xff] }
 0x1f5   : > { %v1332_v38 = vmax.f32 %v1310_v28, 0.0  ;;  %v2839_v28 = vunpack.i.h.bf16 %v2837_v54  ;;  %v2838_v2 = vunpack.i.l.bf16 %v2837_v54 }
 0x1f7   : > { %v1421_v31 = vsel %vm4179_vm13, %v1332_v38, 0.0  ;;  %3096 = vrot.lane.b32.xlu1 %v3090_v63, %s3162_s22  ;;  %v1978_v60 = vsel %vm936_vm2, %v3862_v21, %v2839_v28 }
 0x1f8   : > { %v1471_v52 = vrot.slane %v1421_v31, 7  ;;  %3101 = vrot.lane.b32.xlu0 %v3100_v15, %s3163_s10  ;;  %v2210_v15 = vld [vmem:[%s4431_s5] sm:$0xff]  ;;  %v2843_v31 = vunpack.i.l.bf16 %v2842_v56 }
 0x1fa   : > { %v1472_v48 = vsel %vm1442_vm12, %v1470_v61, %v1471_v52  ;;  %v1520_v23 = vsel %vm1442_vm12, %v1471_v52, 0.0  ;;  %v3165_v61 = vmov 0  }
 0x1fb   : > { %v1920_v11 = vrot.slane %v1472_v48, 1  ;;  %v1922_v27 = vrot.slane %v1520_v23, 1  ;;  %v1973_v34 = vrot.slane %v1472_v48, 2  ;;  %v1975_v16 = vrot.slane %v1520_v23, 2  ;;  %3115 = vset.pattern.permute.xlu1 %v3165_v61  ;;  %3116 = vset.pattern.permute.xlu0 %v3165_v61 }
 0x1fc   : > { %v3105_v41 = vpack.i.bf16 %v1472_v48, %v1510_v58  ;;  %v2844_v58 = vunpack.i.h.bf16 %v2842_v56 }
 0x1fd   : > { %v1921_v57 = vsel %vm388_vm0, %v1919_v3, %v1920_v11  ;;  %v1923_v37 = vsel %vm388_vm0, %v1920_v11, %v1922_v27  ;;  %v4216_v53 = vsel %vm499_vm1, %v1972_v50, %v1973_v34  ;;  %v4219_v5 = vsel %vm499_vm1, %v1973_v34, %v1975_v16 }
 0x1fe   : > { %3106 = vrot.lane.b32.xlu1 %v3105_v41, %s3160_s15  ;;  %v3110_v26 = vpack.i.bf16 %v1923_v37, %v1921_v57  ;;  %v2445_v36 = vpack.c.bf16 %v4219_v5, %v4216_v53  ;;  %v2847_v59 = vpop.permute.xlu1 %2846  ;;  %v1977_v3 = vsel %vm936_vm2, %v3855_v13, %v2838_v2  ;;  %v1994_v34 = vsel %vm957_vm3, %v1978_v60, %v2844_v58 }
 0x1ff   : > { %v2849_v50 = vunpack.i.h.bf16 %v2847_v59  ;;  %v2848_v48 = vunpack.i.l.bf16 %v2847_v59  ;;  %v1993_v27 = vsel %vm957_vm3, %v1977_v3, %v2843_v31 }
 0x200   : > { %3111 = vrot.lane.b32.xlu0 %v3110_v26, %s3164_s18 }
 0x201   : > { %v2852_v63 = vpop.permute.xlu0 %2851  ;;  %v2009_v54 = vsel %vm978_vm4, %v1993_v27, %v2848_v48  ;;  %v2010_v57 = vsel %vm978_vm4, %v1994_v34, %v2849_v50 }
 0x202   : > { %2214 = vperm.xlu1 %3115, %v2210_v15   ;;  %v2857_v38 = vpop.permute.xlu1 %2856  ;;  %v2854_v23 = vunpack.i.h.bf16 %v2852_v63  ;;  %v2853_v11 = vunpack.i.l.bf16 %v2852_v63 }
 0x203   : > { %v2859_v37 = vunpack.i.h.bf16 %v2857_v38  ;;  %v2858_v26 = vunpack.i.l.bf16 %v2857_v38 }
 0x204   : > { %2219 = vperm.xlu0 %3116, %v2211_v20   ;;  %v2025_v21 = vsel %vm999_vm5, %v2009_v54, %v2853_v11  ;;  %v2026_v13 = vsel %vm999_vm5, %v2010_v57, %v2854_v23 }
 0x205   : > { %v2862_v52 = vpop.permute.xlu0 %2861  ;;  %v2041_v20 = vsel %vm1020_vm6, %v2025_v21, %v2858_v26  ;;  %v2042_v61 = vsel %vm1020_vm6, %v2026_v13, %v2859_v37 }
 0x206   : > { %v2867_v16 = vpop.permute.xlu1 %2866  ;;  %v2864_v58 = vunpack.i.h.bf16 %v2862_v52  ;;  %v2863_v31 = vunpack.i.l.bf16 %v2862_v52 }
 0x207   : > { %v2869_v27 = vunpack.i.h.bf16 %v2867_v16  ;;  %v2868_v34 = vunpack.i.l.bf16 %v2867_v16 }
 0x208   : > { %v1979_v54 = vsel %vm936_vm2, %v3883_v0, %v2863_v31 }
 0x20d   : > { %v2872_v41 = vpop.permute.xlu0 %2871 }
 0x20e   : > { %v2874_v56 = vunpack.i.h.bf16 %v2872_v41  ;;  %v2873_v59 = vunpack.i.l.bf16 %v2872_v41  ;;  %v1980_v41 = vsel %vm936_vm2, %v3889_v49, %v2864_v58  ;;  %v1995_v49 = vsel %vm957_vm3, %v1979_v54, %v2868_v34 }
 0x20f   : > { %v1996_v16 = vsel %vm957_vm3, %v1980_v41, %v2869_v27 }
 0x210   : > { %v2057_v60 = vsel %vm1041_vm7, %v2041_v20, %v2873_v59  ;;  %v2058_v38 = vsel %vm1041_vm7, %v2042_v61, %v2874_v56 }
 0x211   : > { %v2882_v15 = vpop.permute.xlu1 %2881  ;;  %v2877_v63 = vpop.permute.xlu0 %2876 }
 0x212   : > { %v2884_v28 = vunpack.i.h.bf16 %v2882_v15  ;;  %v2883_v2 = vunpack.i.l.bf16 %v2882_v15  ;;  %v2879_v52 = vunpack.i.h.bf16 %v2877_v63  ;;  %v2878_v57 = vunpack.i.l.bf16 %v2877_v63 }
 0x214   : > { %v2073_v3 = vsel %vm1062_vm8, %v2057_v60, %v2883_v2  ;;  %v2074_v50 = vsel %vm1062_vm8, %v2058_v38, %v2884_v28  ;;  %v2011_v56 = vsel %vm978_vm4, %v1995_v49, %v2878_v57  ;;  %v2012_v0 = vsel %vm978_vm4, %v1996_v16, %v2879_v52 }
 0x215   : > { %v2887_v48 = vpop.permute.xlu1 %2886  ;;  %v2892_v23 = vpop.permute.xlu0 %2891  ;;  %v2413_v11 = vpack.c.bf16 %v2074_v50, %v2073_v3 }
 0x216   : > { %v2889_v37 = vunpack.i.h.bf16 %v2887_v48  ;;  %v2888_v26 = vunpack.i.l.bf16 %v2887_v48  ;;  %v2894_v59 = vunpack.i.h.bf16 %v2892_v23  ;;  %v2893_v15 = vunpack.i.l.bf16 %v2892_v23 }
 0x217   : > { %2414 = vmatpush1.bf16.xpose.msra.mxu1 %v2413_v11 }
 0x218   : > { %2417 = vmatprep.subr.msk.bf16.mxu1 %vm3940_vm9, %v2415_v7  ;;  %v2027_v63 = vsel %vm999_vm5, %v2011_v56, %v2888_v26  ;;  %v2028_v20 = vsel %vm999_vm5, %v2012_v0, %v2889_v37 }
 0x219   : > { %v2897_v21 = vpop.permute.xlu1 %2896  ;;  %v2902_v13 = vpop.permute.xlu0 %2901  ;;  %v2043_v58 = vsel %vm1020_vm6, %v2027_v63, %v2893_v15  ;;  %v2044_v31 = vsel %vm1020_vm6, %v2028_v20, %v2894_v59 }
 0x21a   : > { %v2899_v11 = vunpack.i.h.bf16 %v2897_v21  ;;  %v2898_v27 = vunpack.i.l.bf16 %v2897_v21  ;;  %v2904_v41 = vunpack.i.h.bf16 %v2902_v13  ;;  %v2903_v54 = vunpack.i.l.bf16 %v2902_v13 }
 0x21c   : > { %v1982_v37 = vsel %vm936_vm2, %v3921_v6, %v2899_v11  ;;  %v1981_v26 = vsel %vm936_vm2, %v3916_v30, %v2898_v27 }
 0x21d   : > { %v2907_v42 = vpop.permute.xlu1 %2906  ;;  %v2917_v8 = vpop.permute.xlu0 %2916  ;;  %v1997_v21 = vsel %vm957_vm3, %v1981_v26, %v2903_v54  ;;  %v1998_v13 = vsel %vm957_vm3, %v1982_v37, %v2904_v41 }
 0x21e   : > { %v2909_v61 = vunpack.i.h.bf16 %v2907_v42  ;;  %v2908_v7 = vunpack.i.l.bf16 %v2907_v42  ;;  %v2919_v28 = vunpack.i.h.bf16 %v2917_v8  ;;  %v2918_v2 = vunpack.i.l.bf16 %v2917_v8 }
 0x220   : > { %v2059_v60 = vsel %vm1041_vm7, %v2043_v58, %v2908_v7  ;;  %v2060_v38 = vsel %vm1041_vm7, %v2044_v31, %v2909_v61 }
 0x221   : > { %v2912_v3 = vpop.permute.xlu1 %2911  ;;  %v2922_v50 = vpop.permute.xlu0 %2921  ;;  %v2075_v48 = vsel %vm1062_vm8, %v2059_v60, %v2918_v2  ;;  %v2076_v23 = vsel %vm1062_vm8, %v2060_v38, %v2919_v28 }
 0x222   : > { %v2418_v34 = vpack.c.bf16 %v2076_v23, %v2075_v48  ;;  %v2914_v16 = vunpack.i.h.bf16 %v2912_v3  ;;  %v2913_v49 = vunpack.i.l.bf16 %v2912_v3  ;;  %v2924_v56 = vunpack.i.h.bf16 %v2922_v50 }
 0x223   : > { %v2923_v0 = vunpack.i.l.bf16 %v2922_v50 }
 0x224   : > { %2419 = vmatpush1.bf16.xpose.msra.mxu1 %v2418_v34  ;;  %v2013_v6 = vsel %vm978_vm4, %v1997_v21, %v2913_v49  ;;  %v2014_v30 = vsel %vm978_vm4, %v1998_v13, %v2914_v16 }
 0x225   : > { %v2927_v52 = vpop.permute.xlu1 %2926  ;;  %v2932_v57 = vpop.permute.xlu0 %2931  ;;  %2422 = vmatprep.subr.msk.bf16.mxu1 %vm3940_vm9, %v2420_v4  ;;  %v2029_v35 = vsel %vm999_vm5, %v2013_v6, %v2923_v0  ;;  %v2030_v51 = vsel %vm999_vm5, %v2014_v30, %v2924_v56 }
 0x226   : > { %v2929_v63 = vunpack.i.h.bf16 %v2927_v52  ;;  %v2928_v20 = vunpack.i.l.bf16 %v2927_v52  ;;  %v2934_v50 = vunpack.i.h.bf16 %v2932_v57  ;;  %v2933_v48 = vunpack.i.l.bf16 %v2932_v57 }
 0x228   : > { %v2045_v7 = vsel %vm1020_vm6, %v2029_v35, %v2928_v20  ;;  %v2046_v28 = vsel %vm1020_vm6, %v2030_v51, %v2929_v63  ;;  %v1984_v16 = vsel %vm936_vm2, %v3962_v25, %v2934_v50  ;;  %v1983_v57 = vsel %vm936_vm2, %v3957_v47, %v2933_v48 }
 0x229   : > { %v2937_v59 = vpop.permute.xlu1 %2936  ;;  %v2942_v15 = vpop.permute.xlu0 %2941 }
 0x22a   : > { %v2944_v42 = vunpack.i.h.bf16 %v2942_v15  ;;  %v2943_v8 = vunpack.i.l.bf16 %v2942_v15  ;;  %v2939_v34 = vunpack.i.h.bf16 %v2937_v59  ;;  %v2938_v41 = vunpack.i.l.bf16 %v2937_v59 }
 0x22c   : > { %v2061_v31 = vsel %vm1041_vm7, %v2045_v7, %v2943_v8  ;;  %v2062_v60 = vsel %vm1041_vm7, %v2046_v28, %v2944_v42  ;;  %v2000_v13 = vsel %vm957_vm3, %v1984_v16, %v2939_v34  ;;  %v1999_v56 = vsel %vm957_vm3, %v1983_v57, %v2938_v41 }
 0x22d   : > { %v2952_v4 = vpop.permute.xlu1 %2951  ;;  %v2947_v61 = vpop.permute.xlu0 %2946 }
 0x22e   : > { %v2954_v2 = vunpack.i.h.bf16 %v2952_v4  ;;  %v2953_v58 = vunpack.i.l.bf16 %v2952_v4  ;;  %v2949_v54 = vunpack.i.h.bf16 %v2947_v61  ;;  %v2948_v52 = vunpack.i.l.bf16 %v2947_v61 }
 0x230   : > { %v2077_v38 = vsel %vm1062_vm8, %v2061_v31, %v2953_v58  ;;  %v2078_v3 = vsel %vm1062_vm8, %v2062_v60, %v2954_v2  ;;  %v2015_v0 = vsel %vm978_vm4, %v1999_v56, %v2948_v52  ;;  %v2016_v59 = vsel %vm978_vm4, %v2000_v13, %v2949_v54 }
 0x231   : > { %v2957_v23 = vpop.permute.xlu1 %2956  ;;  %v2962_v11 = vpop.permute.xlu0 %2961  ;;  %v2423_v27 = vpack.c.bf16 %v2078_v3, %v2077_v38 }
 0x232   : > { %v2959_v37 = vunpack.i.h.bf16 %v2957_v23  ;;  %v2958_v26 = vunpack.i.l.bf16 %v2957_v23  ;;  %v2964_v24 = vunpack.i.h.bf16 %v2962_v11  ;;  %v2963_v46 = vunpack.i.l.bf16 %v2962_v11 }
 0x233   : > { %2424 = vmatpush1.bf16.xpose.msra.mxu1 %v2423_v27 }
 0x234   : > { %2427 = vmatprep.subr.msk.bf16.mxu1 %vm3940_vm9, %v2425_v22  ;;  %v2031_v22 = vsel %vm999_vm5, %v2015_v0, %v2958_v26  ;;  %v2032_v15 = vsel %vm999_vm5, %v2016_v59, %v2959_v37 }
 0x235   : > { %v2967_v49 = vpop.permute.xlu1 %2966  ;;  %v2972_v21 = vpop.permute.xlu0 %2971  ;;  %v2047_v42 = vsel %vm1020_vm6, %v2031_v22, %v2963_v46  ;;  %v2048_v8 = vsel %vm1020_vm6, %v2032_v15, %v2964_v24 }
 0x236   : > { %v2969_v2 = vunpack.i.h.bf16 %v2967_v49  ;;  %v2968_v58 = vunpack.i.l.bf16 %v2967_v49  ;;  %v2974_v60 = vunpack.i.h.bf16 %v2972_v21  ;;  %v2973_v38 = vunpack.i.l.bf16 %v2972_v21 }
 0x238   : > { %v1986_v48 = vsel %vm936_vm2, %v4007_v19, %v2969_v2  ;;  %v1985_v23 = vsel %vm936_vm2, %v3997_v33, %v2968_v58 }
 0x239   : > { %v2977_v25 = vpop.permute.xlu1 %2976  ;;  %v2987_v6 = vpop.permute.xlu0 %2986  ;;  %v2001_v34 = vsel %vm957_vm3, %v1985_v23, %v2973_v38  ;;  %v2002_v41 = vsel %vm957_vm3, %v1986_v48, %v2974_v60 }
 0x23a   : > { %v2979_v30 = vunpack.i.h.bf16 %v2977_v25  ;;  %v2978_v47 = vunpack.i.l.bf16 %v2977_v25  ;;  %v2989_v63 = vunpack.i.h.bf16 %v2987_v6  ;;  %v2988_v20 = vunpack.i.l.bf16 %v2987_v6 }
 0x23c   : > { %v2063_v35 = vsel %vm1041_vm7, %v2047_v42, %v2978_v47  ;;  %v2064_v51 = vsel %vm1041_vm7, %v2048_v8, %v2979_v30 }
 0x23d   : > { %v2982_v4 = vpop.permute.xlu1 %2981  ;;  %v2992_v61 = vpop.permute.xlu0 %2991  ;;  %v2079_v7 = vsel %vm1062_vm8, %v2063_v35, %v2988_v20  ;;  %v2080_v28 = vsel %vm1062_vm8, %v2064_v51, %v2989_v63 }
 0x23e   : > { %v2428_v31 = vpack.c.bf16 %v2080_v28, %v2079_v7  ;;  %v2984_v11 = vunpack.i.h.bf16 %v2982_v4  ;;  %v2983_v27 = vunpack.i.l.bf16 %v2982_v4  ;;  %v2994_v54 = vunpack.i.h.bf16 %v2992_v61 }
 0x23f   : > { %v2993_v52 = vunpack.i.l.bf16 %v2992_v61 }
 0x240   : > { %2429 = vmatpush1.bf16.xpose.msra.mxu1 %v2428_v31  ;;  %v2017_v19 = vsel %vm978_vm4, %v2001_v34, %v2983_v27  ;;  %v2018_v26 = vsel %vm978_vm4, %v2002_v41, %v2984_v11 }
 0x241   : > { %v2997_v3 = vpop.permute.xlu1 %2996  ;;  %v3002_v50 = vpop.permute.xlu0 %3001  ;;  %2432 = vmatprep.subr.msk.bf16.mxu1 %vm3940_vm9, %v2430_v18  ;;  %v2033_v9 = vsel %vm999_vm5, %v2017_v19, %v2993_v52  ;;  %v2034_v43 = vsel %vm999_vm5, %v2018_v26, %v2994_v54 }
 0x242   : > { %v2999_v33 = vunpack.i.h.bf16 %v2997_v3  ;;  %v2998_v16 = vunpack.i.l.bf16 %v2997_v3  ;;  %v3004_v6 = vunpack.i.h.bf16 %v3002_v50  ;;  %v3003_v30 = vunpack.i.l.bf16 %v3002_v50 }
 0x244   : > { %v2049_v13 = vsel %vm1020_vm6, %v2033_v9, %v2998_v16  ;;  %v2050_v56 = vsel %vm1020_vm6, %v2034_v43, %v2999_v33  ;;  %v1988_v7 = vsel %vm936_vm2, %v4050_v44, %v3004_v6  ;;  %v1987_v28 = vsel %vm936_vm2, %v4041_v39, %v3003_v30 }
 0x245   : > { %v3007_v37 = vpop.permute.xlu1 %3006 }
 0x246   : > { %v3012_v57 = vpop.permute.xlu0 %3011  ;;  %v3009_v20 = vunpack.i.h.bf16 %v3007_v37  ;;  %v3008_v42 = vunpack.i.l.bf16 %v3007_v37 }
 0x247   : > { %v3014_v49 = vunpack.i.h.bf16 %v3012_v57  ;;  %v3013_v21 = vunpack.i.l.bf16 %v3012_v57 }
 0x248   : > { %v2004_v58 = vsel %vm957_vm3, %v1988_v7, %v3009_v20  ;;  %v2003_v31 = vsel %vm957_vm3, %v1987_v28, %v3008_v42 }
 0x249   : > { %v3022_v18 = vpop.permute.xlu1 %3021  ;;  %v2065_v46 = vsel %vm1041_vm7, %v2049_v13, %v3013_v21  ;;  %v2066_v22 = vsel %vm1041_vm7, %v2050_v56, %v3014_v49 }
 0x24a   : > { %v3024_v0 = vunpack.i.h.bf16 %v3022_v18  ;;  %v3023_v59 = vunpack.i.l.bf16 %v3022_v18  ;;  %v3017_v24 = vpop.permute.xlu0 %3016 }
 0x24b   : > { %v3019_v35 = vunpack.i.h.bf16 %v3017_v24  ;;  %v3018_v51 = vunpack.i.l.bf16 %v3017_v24 }
 0x24c   : > { %v2081_v15 = vsel %vm1062_vm8, %v2065_v46, %v3023_v59  ;;  %v2082_v25 = vsel %vm1062_vm8, %v2066_v22, %v3024_v0 }
 0x24d   : > { %v3027_v47 = vpop.permute.xlu1 %3026  ;;  %v2433_v63 = vpack.c.bf16 %v2082_v25, %v2081_v15  ;;  %v2019_v38 = vsel %vm978_vm4, %v2003_v31, %v3018_v51  ;;  %v2020_v3 = vsel %vm978_vm4, %v2004_v58, %v3019_v35 }
 0x24e   : > { %v3032_v8 = vpop.permute.xlu0 %3031  ;;  %v3029_v4 = vunpack.i.h.bf16 %v3027_v47  ;;  %v3028_v61 = vunpack.i.l.bf16 %v3027_v47 }
 0x24f   : > { %2434 = vmatpush1.bf16.xpose.msra.mxu1 %v2433_v63  ;;  %v3034_v62 = vunpack.i.h.bf16 %v3032_v8  ;;  %v3033_v17 = vunpack.i.l.bf16 %v3032_v8 }
 0x250   : > { %2437 = vmatprep.subr.msk.bf16.mxu1 %vm3940_vm9, %v2435_v10  ;;  %v2035_v10 = vsel %vm999_vm5, %v2019_v38, %v3028_v61  ;;  %v2036_v50 = vsel %vm999_vm5, %v2020_v3, %v3029_v4 }
 0x251   : > { %v3037_v2 = vpop.permute.xlu1 %3036  ;;  %v2051_v11 = vsel %vm1020_vm6, %v2035_v10, %v3033_v17  ;;  %v2052_v27 = vsel %vm1020_vm6, %v2036_v50, %v3034_v62 }
 0x252   : > { %v3042_v60 = vpop.permute.xlu0 %3041  ;;  %v3039_v33 = vunpack.i.h.bf16 %v3037_v2  ;;  %v3038_v16 = vunpack.i.l.bf16 %v3037_v2 }
 0x253   : > { %v3044_v21 = vunpack.i.h.bf16 %v3042_v60  ;;  %v3043_v9 = vunpack.i.l.bf16 %v3042_v60 }
 0x254   : > { %v1990_v18 = vsel %vm936_vm2, %v4094_v40, %v3039_v33  ;;  %v1989_v13 = vsel %vm936_vm2, %v4083_v29, %v3038_v16 }
 0x255   : > { %v3047_v44 = vpop.permute.xlu1 %3046  ;;  %v2005_v24 = vsel %vm957_vm3, %v1989_v13, %v3043_v9  ;;  %v2006_v46 = vsel %vm957_vm3, %v1990_v18, %v3044_v21  ;;  %v2092_v18 = vld [vmem:[%s4430_s4 + $0x18] sm:$0xff]  ;;  %v2091_v13 = vld [vmem:[%s4430_s4 + $0x10] sm:$0xff] }
 0x256   : > { %v3049_v48 = vunpack.i.h.bf16 %v3047_v44  ;;  %v3048_v23 = vunpack.i.l.bf16 %v3047_v44  ;;  %v3057_v39 = vpop.permute.xlu0 %3056 }
 0x257   : > { %v3059_v34 = vunpack.i.h.bf16 %v3057_v39  ;;  %v3058_v41 = vunpack.i.l.bf16 %v3057_v39 }
 0x258   : > { %v2067_v54 = vsel %vm1041_vm7, %v2051_v11, %v3048_v23  ;;  %v2068_v52 = vsel %vm1041_vm7, %v2052_v27, %v3049_v48 }
 0x259   : > { %v3052_v37 = vpop.permute.xlu1 %3051  ;;  %v2083_v19 = vsel %vm1062_vm8, %v2067_v54, %v3058_v41  ;;  %v2084_v26 = vsel %vm1062_vm8, %v2068_v52, %v3059_v34 }
 0x25a   : > { %v3062_v57 = vpop.permute.xlu0 %3061  ;;  %v2438_v49 = vpack.c.bf16 %v2084_v26, %v2083_v19  ;;  %v3054_v56 = vunpack.i.h.bf16 %v3052_v37  ;;  %v3053_v0 = vunpack.i.l.bf16 %v3052_v37 }
 0x25b   : > { %v3064_v22 = vunpack.i.h.bf16 %v3062_v57  ;;  %v3063_v15 = vunpack.i.l.bf16 %v3062_v57 }
 0x25c   : > { %2439 = vmatpush1.bf16.xpose.msra.mxu1 %v2438_v49  ;;  %v2021_v55 = vsel %vm978_vm4, %v2005_v24, %v3053_v0  ;;  %v2022_v12 = vsel %vm978_vm4, %v2006_v46, %v3054_v56  ;;  %v2206_v56 = vld [vmem:[%s310_s8] sm:$0xff] }
 0x25d   : > { %v3067_v43 = vpop.permute.xlu1 %3066  ;;  %2442 = vmatprep.subr.msk.bf16.mxu1 %vm3940_vm9, %v2440_v45  ;;  %v2037_v29 = vsel %vm999_vm5, %v2021_v55, %v3063_v15  ;;  %v2038_v63 = vsel %vm999_vm5, %v2022_v12, %v3064_v22  ;;  %v2207_v22 = vld [vmem:[%s310_s8 + $0x8] sm:$0xff] }
 0x25e   : > { %v3072_v59 = vpop.permute.xlu0 %3071  ;;  %v3069_v45 = vunpack.i.h.bf16 %v3067_v43  ;;  %v3068_v6 = vunpack.i.l.bf16 %v3067_v43  ;;  %v2089_v43 = vld [vmem:[%s4430_s4] sm:$0xff] }
 0x25f   : > { %v3074_v58 = vunpack.i.h.bf16 %v3072_v59  ;;  %v3073_v31 = vunpack.i.l.bf16 %v3072_v59 }
 0x260   : > { %v2053_v42 = vsel %vm1020_vm6, %v2037_v29, %v3068_v6  ;;  %v2054_v8 = vsel %vm1020_vm6, %v2038_v63, %v3069_v45 }
 0x261   : > { %v3077_v25 = vpop.permute.xlu1 %3076  ;;  %v1992_v23 = vsel %vm936_vm2, %v4136_v14, %v3074_v58  ;;  %v1991_v39 = vsel %vm936_vm2, %v4125_v32, %v3073_v31 }
 0x262   : > { %v3082_v40 = vpop.permute.xlu0 %3081  ;;  %v3079_v3 = vunpack.i.h.bf16 %v3077_v25  ;;  %v3078_v62 = vunpack.i.l.bf16 %v3077_v25 }
 0x263   : > { %v3084_v30 = vunpack.i.h.bf16 %v3082_v40  ;;  %v3083_v47 = vunpack.i.l.bf16 %v3082_v40 }
 0x264   : > { %v2008_v11 = vsel %vm957_vm3, %v1992_v23, %v3079_v3  ;;  %v2007_v27 = vsel %vm957_vm3, %v1991_v39, %v3078_v62 }
 0x265   : > { %v3092_v20 = vpop.permute.xlu1 %3091  ;;  %v2069_v61 = vsel %vm1041_vm7, %v2053_v42, %v3083_v47  ;;  %v2070_v7 = vsel %vm1041_vm7, %v2054_v8, %v3084_v30 }
 0x266   : > { %v3094_v35 = vunpack.i.h.bf16 %v3092_v20  ;;  %v3093_v51 = vunpack.i.l.bf16 %v3092_v20  ;;  %v3087_v4 = vpop.permute.xlu0 %3086 }
 0x267   : > { %v3089_v17 = vunpack.i.h.bf16 %v3087_v4  ;;  %v3088_v10 = vunpack.i.l.bf16 %v3087_v4 }
 0x268   : > { %v2085_v28 = vsel %vm1062_vm8, %v2069_v61, %v3093_v51  ;;  %v2086_v2 = vsel %vm1062_vm8, %v2070_v7, %v3094_v35 }
 0x269   : > { %v3097_v60 = vpop.permute.xlu1 %3096  ;;  %v2443_v38 = vpack.c.bf16 %v2086_v2, %v2085_v28  ;;  %v2023_v34 = vsel %vm978_vm4, %v2007_v27, %v3088_v10  ;;  %v2024_v41 = vsel %vm978_vm4, %v2008_v11, %v3089_v17 }
 0x26a   : > { %v3099_v50 = vunpack.i.h.bf16 %v3097_v60  ;;  %v3098_v44 = vunpack.i.l.bf16 %v3097_v60  ;;  %v3102_v48 = vpop.permute.xlu0 %3101 }
 0x26b   : > { %2444 = vmatpush1.bf16.xpose.msra.mxu1 %v2443_v38  ;;  %v3104_v54 = vunpack.i.h.bf16 %v3102_v48  ;;  %v3103_v52 = vunpack.i.l.bf16 %v3102_v48 }
 0x26c   : > { %2447 = vmatprep.subr.msk.bf16.mxu1 %vm3940_vm9, %v2445_v36  ;;  %v2039_v53 = vsel %vm999_vm5, %v2023_v34, %v3098_v44  ;;  %v2040_v1 = vsel %vm999_vm5, %v2024_v41, %v3099_v50 }
 0x26d   : > { %v2055_v32 = vsel %vm1020_vm6, %v2039_v53, %v3103_v52  ;;  %v2056_v19 = vsel %vm1020_vm6, %v2040_v1, %v3104_v54 }
 0x270   : > { %v3107_v5 = vpop.permute.xlu1 %3106 }
 0x271   : > { %v3109_v36 = vunpack.i.h.bf16 %v3107_v5  ;;  %v3108_v14 = vunpack.i.l.bf16 %v3107_v5 }
 0x272   : > { %v3112_v37 = vpop.permute.xlu0 %3111 }
 0x273   : > { %v3114_v26 = vunpack.i.h.bf16 %v3112_v37  ;;  %v3113_v33 = vunpack.i.l.bf16 %v3112_v37  ;;  %v2071_v16 = vsel %vm1041_vm7, %v2055_v32, %v3108_v14  ;;  %v2072_v57 = vsel %vm1041_vm7, %v2056_v19, %v3109_v36 }
 0x275   : > { %v2087_v49 = vsel %vm1062_vm8, %v2071_v16, %v3113_v33  ;;  %v2088_v21 = vsel %vm1062_vm8, %v2072_v57, %v3114_v26 }
 0x276   : > { %v2448_v9 = vpack.c.bf16 %v2088_v21, %v2087_v49 }
 0x278   : > { %2449 = vmatpush1.bf16.xpose.msra.mxu1 %v2448_v9 }
 0x27f   : > { %2196 = vmatmul.mubr.f32.vlgmr.msra.gmra.mrb[0].mxu1 %v2089_v43 }
 0x280   : > { %2378 = vmatprep.mubr.msk.f32.mxu1 %vm936_vm2, %v2092_v18 }
 0x281   : > { %v2215_v59 = vpop.permute.xlu1 %2214 }
 0x283   : > { %2201 = vmatmul.mubr.f32.gmra.mrb[2].mxu1 %v2091_v13  ;;  %v2220_v55 = vpop.permute.xlu0 %2219 }
 0x352   : > { %v2197_v0 = vpop.f32.mrb[0].mxu1 }
 0x353   : > { %v2208_v24 = vadd.f32 %v2206_v56, %v2197_v0  ;;  %v2199_v46 = vpop.f32.mrb[1].mxu1 }
 0x355   : > { %v2222_v15 = vadd.f32 %v2215_v59, %v2208_v24 }
 0x356   : > { %v2202_v25 = vpop.f32.mrb[2].mxu1 }
 0x357   : > { %2224 = vst [vmem:[%s319_s21] sm:$0xff] %v2222_v15  ;;  %v2209_v12 = vadd.f32 %v2207_v22, %v2202_v25  ;;  %v2204_v45 = vpop.f32.mrb[3].mxu1 }
 0x359   : > { %v2223_v6 = vadd.f32 %v2220_v55, %v2209_v12 }
 0x35b   : > { %2225 = vst [vmem:[%s319_s21 + $0x8] sm:$0xff] %v2223_v6 }
 0x35c PF: > { %s16_s25 = sadd.s32 1, %s3155_s25   ;;  %s4453_s21 = smov %s3147_s23 }
 0x35d   : > { %p13_p6 = scmp.ge.s32.totalorder %s16_s25, 6   ;;  %s4454_s22 = smov %s3151_s24 }
 0x35e   : > { %s4455_s23 = smov %s4458_s26  ;;  %s4456_s24 = smov %s4462_s27 }
 0x35f   :  { %15 = sbr.rel (!%p13_p6) target bundleno = 3 (0x3), region = 77 }

</bundles_post_ra>
